<compile_context>
chip_gen: v5e
topology: v5e:2x2
jax: 0.10.0
libtpu: 0.0.40
codegen_flags: <defaults>
</compile_context>

<pallas_src>
import functools

import jax
import jax.numpy as jnp
from jax import lax
from jax.experimental import pallas as pl
from jax.experimental.pallas import tpu as pltpu


def _soft_threshold(z, thr):
    # soft_threshold(z, thr) = sign(z) * max(|z| - thr, 0) == z - clip(z, -thr, thr)
    # (3 VALU ops instead of ~6; the kernel is VALU-bound at small/medium dim_x).
    return z - jnp.clip(z, -thr, thr)


def _ista_gram_kernel(steps_ref, g_ref, wt_ref, y_ref, x_ref, *,
                      n_iter, lambd, n_chunks):
    """Unrolled ISTA over one tile of data columns, Gram-matrix form.

    steps_ref : SMEM (n_iter,)         -- steps[t] / lipschitz (pre-divided in glue)
    g_ref     : VMEM (dim_x, dim_x)    -- G = W^T W, already in the MXU operand dtype
    wt_ref    : VMEM (dim_x, dim_y)    -- W^T (f32, resident across the grid)
    y_ref     : VMEM (dim_y, tn)       -- data column tile
    x_ref     : VMEM (dim_x, tn)       -- output sparse-code tile
    """
    G = g_ref[...]                     # resident; no per-step cast (cast in wrapper)
    mm_dtype = G.dtype

    # Fused B: b = W^T y for this column tile (avoids materializing B in HBM).
    b_full = jnp.dot(wt_ref[...], y_ref[...], preferred_element_type=jnp.float32)

    tn = x_ref.shape[1]
    csz = tn // n_chunks
    b = [b_full[:, c * csz:(c + 1) * csz] for c in range(n_chunks)]

    # --- iteration 0 peeled: x == 0  =>  grad = -b, no matmul ----------------
    step0 = steps_ref[0]
    thr0 = step0 * lambd
    xs = tuple(_soft_threshold(step0 * b[c], thr0) for c in range(n_chunks))

    # --- iterations 1 .. n_iter-1: one MXU matmul per chunk, chunks are ------
    # --- independent chains so MXU and VPU work can overlap. -----------------
    def body(t, xs):
        step = steps_ref[t]
        thr = step * lambd
        grads = [jnp.dot(G, xs[c].astype(mm_dtype),
                         preferred_element_type=jnp.float32) - b[c]
                 for c in range(n_chunks)]
        return tuple(_soft_threshold(xs[c] - step * grads[c], thr)
                     for c in range(n_chunks))

    unroll = True if n_iter <= 16 else 4
    xs = lax.fori_loop(1, n_iter, body, xs, unroll=unroll)

    for c in range(n_chunks):
        x_ref[:, c * csz:(c + 1) * csz] = xs[c]


# ---------------------------------------------------------------------------
# VMEM budgeting (generation-aware) and tile selection.
# ---------------------------------------------------------------------------

def _vmem_budget():
    """Returns (tile-pick budget, vmem_limit cap) in bytes for this generation."""
    cap = 64 << 20                                   # conservative default (v7x per-TC)
    try:
        cap = int(pltpu.get_tpu_info().vmem_capacity_bytes)
    except Exception:
        pass
    if cap >= (128 << 20):                           # v5e / v6e: 128 MiB VMEM
        return 88 << 20, 100 << 20
    return 34 << 20, 48 << 20                        # v7x: 64 MiB per TensorCore


def _tile_bytes(dim_x, dim_y, tn, g_bytes):
    """VMEM footprint estimate for one grid step (buffers + loop temporaries)."""
    g = 2 * dim_x * dim_x * g_bytes                  # resident G (double-buffered)
    wt = 2 * dim_x * dim_y * 4                       # resident W^T (f32)
    y_in = 2 * dim_y * tn * 4                        # double-buffered y tile
    x_out = 2 * dim_x * tn * 4                       # double-buffered x tile
    tmp = 5 * dim_x * tn * 4                         # b, x carry, grad, z, casts
    return g + wt + y_in + x_out + tmp


def _pick_tn(n_p, dim_x, dim_y, g_bytes, budget_bytes, min_grid=4):
    """Largest lane-dense column tile fitting the budget, preferring >=min_grid
    grid steps so the parallel axis pipelines/shards across TensorCores."""
    candidates = [t for t in (2048, 1024, 512, 256, 128) if n_p % t == 0]
    if not candidates:                               # n_p is always a multiple of 128
        candidates = [n_p]
    for t in candidates:
        if _tile_bytes(dim_x, dim_y, t, g_bytes) <= budget_bytes and n_p // t >= min_grid:
            return t
    for t in candidates:
        if _tile_bytes(dim_x, dim_y, t, g_bytes) <= budget_bytes:
            return t
    return candidates[-1]


# ---------------------------------------------------------------------------
# Forward pass wrapper.
# ---------------------------------------------------------------------------

def ista_forward(W, y, steps_over_L, lambd, *, tn=None, matmul_dtype=None,
                 n_chunks=None):
    """Pallas forward pass: returns sparse codes x of shape (dim_x, n_data)."""
    W = W.astype(jnp.float32)
    y = y.astype(jnp.float32)
    dim_y, dim_x = W.shape
    n_data = y.shape[1]
    n_iter = int(steps_over_L.shape[0])

    # bf16 MXU operands only pay when the matmul dominates (large dim_x);
    # for small dim_x the kernel is VPU-bound and the per-iter cast is pure cost.
    if matmul_dtype is None:
        matmul_dtype = jnp.bfloat16 if dim_x >= 256 else jnp.float32
    g_bytes = jnp.dtype(matmul_dtype).itemsize

    # Gram-matrix fusion: hoist W^T W out of the iteration loop (plain XLA);
    # W^T y is computed per-tile inside the kernel (no HBM materialization).
    hi = jax.lax.Precision.HIGHEST
    Wt = W.T                                         # (dim_x, dim_y)
    G = jnp.dot(Wt, W, precision=hi).astype(matmul_dtype)   # cast ONCE, in wrapper

    # Pad the data columns to a multiple of 128 (zero columns -> zero codes).
    n_p = ((n_data + 127) // 128) * 128
    if n_p != n_data:
        y = jnp.pad(y, ((0, 0), (0, n_p - n_data)))

    budget, limit_cap = _vmem_budget()
    if tn is None:
        tn = _pick_tn(n_p, dim_x, dim_y, g_bytes, budget)
    assert n_p % tn == 0, "padded n_data must be a multiple of the column tile"

    if n_chunks is None:
        n_chunks = 2 if (tn % 256 == 0) else 1       # keep chunk width >= 128 lanes
    assert tn % (128 * n_chunks) == 0

    kernel = functools.partial(_ista_gram_kernel, n_iter=n_iter,
                               lambd=float(lambd), n_chunks=n_chunks)

    grid_spec = pltpu.PrefetchScalarGridSpec(
        num_scalar_prefetch=1,                        # steps_over_L -> SMEM
        grid=(n_p // tn,),
        in_specs=[
            pl.BlockSpec((dim_x, dim_x), lambda j, s: (0, 0)),   # G (full, resident)
            pl.BlockSpec((dim_x, dim_y), lambda j, s: (0, 0)),   # W^T (full, resident)
            pl.BlockSpec((dim_y, tn), lambda j, s: (0, j)),      # y column tile
        ],
        out_specs=pl.BlockSpec((dim_x, tn), lambda j, s: (0, j)),  # x column tile
    )

    vmem_need = _tile_bytes(dim_x, dim_y, tn, g_bytes) + (8 << 20)
    vmem_limit = int(min(max(vmem_need, 32 << 20), limit_cap))

    cost = pl.CostEstimate(
        flops=int(n_p * (2 * dim_x * dim_y + max(n_iter - 1, 0) * 2 * dim_x * dim_x
                         + 6 * n_iter * dim_x)),
        transcendentals=0,
        bytes_accessed=int(dim_x * dim_x * g_bytes + 4 * dim_x * dim_y
                           + 4 * dim_y * n_p + 4 * dim_x * n_p),
    )

    out = pl.pallas_call(
        kernel,
        out_shape=jax.ShapeDtypeStruct((dim_x, n_p), jnp.float32),
        grid_spec=grid_spec,
        compiler_params=pltpu.CompilerParams(
            dimension_semantics=("parallel",),
            vmem_limit_bytes=vmem_limit),
        cost_estimate=cost,
    )(steps_over_L.astype(jnp.float32), G, Wt, y)

    if n_p != n_data:
        out = out[:, :n_data]
    return out


# ---------------------------------------------------------------------------
# Glue reproducing BasePriorLearning.fit() setup (rescale, compute_lipschitz).
# ---------------------------------------------------------------------------

def rescale_columns(D):
    """Base class `rescale(atoms='columns')`: unit-norm columns (0-norm -> 1)."""
    norms = jnp.linalg.norm(D, axis=0)
    norms = jnp.where(norms == 0, 1.0, norms)
    return D / norms


def compute_lipschitz(D):
    """Base class `compute_lipschitz`: ||D^T D||_F, with 0 -> 1."""
    lip = jnp.linalg.norm(jnp.matmul(D.T, D, precision=jax.lax.Precision.HIGHEST))
    return jnp.where(lip == 0.0, 1.0, lip)


def reference_forward(W, y, steps_over_L, lambd, n_iter):
    """Pure-JAX reference of the original two-matmul ISTA forward (validation)."""
    hi = jax.lax.Precision.HIGHEST
    x = jnp.zeros((W.shape[1], y.shape[1]), jnp.float32)
    for t in range(n_iter):
        step = steps_over_L[t]
        grad = jnp.dot(W.T, jnp.dot(W, x, precision=hi) - y, precision=hi)
        z = x - step * grad
        x = jnp.sign(z) * jnp.maximum(jnp.abs(z) - step * lambd, 0.0)
    return x


if __name__ == "__main__":
    # Small shapes consistent with the module's conventions.
    dim_y = 32            # measurement dimension (operator = identity -> dim_signal = dim_y)
    n_components = 64     # dim_x: number of atoms in the prior
    n_iter = 8            # unrolled iterations
    lambd = 0.1
    n_data = 1024         # number of data columns (-> tn=256, grid=4, 2 chunks)

    key = jax.random.PRNGKey(0)
    k_data, k_choice = jax.random.split(key)

    # data_y : (dim_y, n_data)
    data_y = jax.random.normal(k_data, (dim_y, n_data), dtype=jnp.float32)

    # Prior initialized from data columns (deterministic stand-in for np.random.choice).
    choice = jax.random.choice(k_choice, n_data, shape=(n_components,))
    prior = rescale_columns(data_y[:, choice])           # (dim_signal, dim_x)
    lipschitz = compute_lipschitz(prior)

    # operator A = identity, so W = A @ D = D.
    W = prior
    steps_over_L = jnp.ones((n_iter,), jnp.float32) / lipschitz   # self.steps / L

    # f32 MXU path (auto default at dim_x=64): must match the two-matmul reference.
    x_codes = jax.block_until_ready(ista_forward(W, data_y, steps_over_L, lambd))
    x_ref = reference_forward(W, data_y, steps_over_L, lambd, n_iter)
    assert x_codes.shape == (n_components, n_data)
    assert jnp.allclose(x_codes, x_ref, atol=1e-4, rtol=1e-4)

    # Explicit bf16-operand MXU path (perf review): looser tolerance.
    x_bf16 = jax.block_until_ready(
        ista_forward(W, data_y, steps_over_L, lambd, matmul_dtype=jnp.bfloat16))
    assert float(jnp.max(jnp.abs(x_bf16 - x_ref))) < 5e-2

    # Ragged n_data (padding path): first 1000 columns must match exactly.
    x_rag = jax.block_until_ready(
        ista_forward(W, data_y[:, :1000], steps_over_L, lambd))
    assert x_rag.shape == (n_components, 1000)
    assert jnp.allclose(x_rag, x_ref[:, :1000], atol=1e-4, rtol=1e-4)

    print("KERNEL_OK")
</pallas_src>

<mosaic_0001>
module attributes {stable_mosaic.version = 11 : i64} {
  func.func @_ista_gram_kernel(%arg0: i32, %arg1: memref<8xf32, #tpu.memory_space<smem>>, %arg2: memref<64x64xf32, #tpu.memory_space<vmem>>, %arg3: memref<64x32xf32, #tpu.memory_space<vmem>>, %arg4: memref<32x256xf32, #tpu.memory_space<vmem>>, %arg5: memref<64x256xf32, #tpu.memory_space<vmem>>) attributes {dimension_semantics = [#tpu.dimension_semantics<parallel>], iteration_bounds = array<i64: 4>, scalar_prefetch = 1 : i64, scratch_operands = 0 : i64, tpu.core_type = #tpu.core_type<tc>, window_params = [{pipeline_mode = #tpu.pipeline_mode<synchronous>, transform_indices = @transform_0, window_bounds = array<i64: 64, 64>}, {pipeline_mode = #tpu.pipeline_mode<synchronous>, transform_indices = @transform_1, window_bounds = array<i64: 64, 32>}, {transform_indices = @transform_2, window_bounds = array<i64: 32, 256>}, {transform_indices = @transform_3, window_bounds = array<i64: 64, 256>}]} {
    %c0 = arith.constant 0 : index
    %c0_0 = arith.constant 0 : index
    %0 = vector.load %arg2[%c0, %c0_0] : memref<64x64xf32, #tpu.memory_space<vmem>>, vector<64x64xf32>
    %c0_1 = arith.constant 0 : index
    %c0_2 = arith.constant 0 : index
    %1 = vector.load %arg3[%c0_1, %c0_2] : memref<64x32xf32, #tpu.memory_space<vmem>>, vector<64x32xf32>
    %c0_3 = arith.constant 0 : index
    %c0_4 = arith.constant 0 : index
    %2 = vector.load %arg4[%c0_3, %c0_4] : memref<32x256xf32, #tpu.memory_space<vmem>>, vector<32x256xf32>
    %cst = arith.constant dense<0.000000e+00> : vector<64x256xf32>
    %3 = tpu.matmul %1, %2, %cst {dimension_numbers = #tpu.dot_dimension_numbers<[1], [0], [0], [1], [0, 0, 1, 1], [], []>} : vector<64x32xf32>, vector<32x256xf32>, vector<64x256xf32> -> vector<64x256xf32>
    %4 = vector.extract_strided_slice %3 {offsets = [0, 0], sizes = [64, 128], strides = [1, 1]} : vector<64x256xf32> to vector<64x128xf32>
    %5 = vector.extract_strided_slice %3 {offsets = [0, 128], sizes = [64, 128], strides = [1, 1]} : vector<64x256xf32> to vector<64x128xf32>
    %c0_5 = arith.constant 0 : index
    %6 = memref.load %arg1[%c0_5] : memref<8xf32, #tpu.memory_space<smem>>
    %cst_6 = arith.constant 1.000000e-01 : f32
    %7 = arith.mulf %6, %cst_6 : f32
    %8 = vector.broadcast %6 : f32 to vector<64x128xf32>
    %9 = arith.mulf %8, %4 : vector<64x128xf32>
    %cst_7 = arith.constant 0.000000e+00 : f32
    %10 = arith.subf %cst_7, %7 : f32
    %11 = vector.broadcast %10 : f32 to vector<64x128xf32>
    %12 = arith.maximumf %11, %9 : vector<64x128xf32>
    %13 = vector.broadcast %7 : f32 to vector<64x128xf32>
    %14 = arith.minimumf %13, %12 : vector<64x128xf32>
    %15 = arith.subf %9, %14 : vector<64x128xf32>
    %16 = vector.broadcast %6 : f32 to vector<64x128xf32>
    %17 = arith.mulf %16, %5 : vector<64x128xf32>
    %cst_8 = arith.constant 0.000000e+00 : f32
    %18 = arith.subf %cst_8, %7 : f32
    %19 = vector.broadcast %18 : f32 to vector<64x128xf32>
    %20 = arith.maximumf %19, %17 : vector<64x128xf32>
    %21 = vector.broadcast %7 : f32 to vector<64x128xf32>
    %22 = arith.minimumf %21, %20 : vector<64x128xf32>
    %23 = arith.subf %17, %22 : vector<64x128xf32>
    %c1_i32 = arith.constant 1 : i32
    %24 = arith.index_cast %c1_i32 : i32 to index
    %25 = memref.load %arg1[%24] : memref<8xf32, #tpu.memory_space<smem>>
    %cst_9 = arith.constant 1.000000e-01 : f32
    %26 = arith.mulf %25, %cst_9 : f32
    %cst_10 = arith.constant dense<0.000000e+00> : vector<64x128xf32>
    %27 = tpu.matmul %0, %15, %cst_10 {dimension_numbers = #tpu.dot_dimension_numbers<[1], [0], [0], [1], [0, 0, 1, 1], [], []>} : vector<64x64xf32>, vector<64x128xf32>, vector<64x128xf32> -> vector<64x128xf32>
    %28 = arith.subf %27, %4 : vector<64x128xf32>
    %cst_11 = arith.constant dense<0.000000e+00> : vector<64x128xf32>
    %29 = tpu.matmul %0, %23, %cst_11 {dimension_numbers = #tpu.dot_dimension_numbers<[1], [0], [0], [1], [0, 0, 1, 1], [], []>} : vector<64x64xf32>, vector<64x128xf32>, vector<64x128xf32> -> vector<64x128xf32>
    %30 = arith.subf %29, %5 : vector<64x128xf32>
    %31 = vector.broadcast %25 : f32 to vector<64x128xf32>
    %32 = arith.mulf %31, %28 : vector<64x128xf32>
    %33 = arith.subf %15, %32 : vector<64x128xf32>
    %cst_12 = arith.constant 0.000000e+00 : f32
    %34 = arith.subf %cst_12, %26 : f32
    %35 = vector.broadcast %34 : f32 to vector<64x128xf32>
    %36 = arith.maximumf %35, %33 : vector<64x128xf32>
    %37 = vector.broadcast %26 : f32 to vector<64x128xf32>
    %38 = arith.minimumf %37, %36 : vector<64x128xf32>
    %39 = arith.subf %33, %38 : vector<64x128xf32>
    %40 = vector.broadcast %25 : f32 to vector<64x128xf32>
    %41 = arith.mulf %40, %30 : vector<64x128xf32>
    %42 = arith.subf %23, %41 : vector<64x128xf32>
    %cst_13 = arith.constant 0.000000e+00 : f32
    %43 = arith.subf %cst_13, %26 : f32
    %44 = vector.broadcast %43 : f32 to vector<64x128xf32>
    %45 = arith.maximumf %44, %42 : vector<64x128xf32>
    %46 = vector.broadcast %26 : f32 to vector<64x128xf32>
    %47 = arith.minimumf %46, %45 : vector<64x128xf32>
    %48 = arith.subf %42, %47 : vector<64x128xf32>
    %c2_i32 = arith.constant 2 : i32
    %49 = arith.index_cast %c2_i32 : i32 to index
    %50 = memref.load %arg1[%49] : memref<8xf32, #tpu.memory_space<smem>>
    %cst_14 = arith.constant 1.000000e-01 : f32
    %51 = arith.mulf %50, %cst_14 : f32
    %cst_15 = arith.constant dense<0.000000e+00> : vector<64x128xf32>
    %52 = tpu.matmul %0, %39, %cst_15 {dimension_numbers = #tpu.dot_dimension_numbers<[1], [0], [0], [1], [0, 0, 1, 1], [], []>} : vector<64x64xf32>, vector<64x128xf32>, vector<64x128xf32> -> vector<64x128xf32>
    %53 = arith.subf %52, %4 : vector<64x128xf32>
    %cst_16 = arith.constant dense<0.000000e+00> : vector<64x128xf32>
    %54 = tpu.matmul %0, %48, %cst_16 {dimension_numbers = #tpu.dot_dimension_numbers<[1], [0], [0], [1], [0, 0, 1, 1], [], []>} : vector<64x64xf32>, vector<64x128xf32>, vector<64x128xf32> -> vector<64x128xf32>
    %55 = arith.subf %54, %5 : vector<64x128xf32>
    %56 = vector.broadcast %50 : f32 to vector<64x128xf32>
    %57 = arith.mulf %56, %53 : vector<64x128xf32>
    %58 = arith.subf %39, %57 : vector<64x128xf32>
    %cst_17 = arith.constant 0.000000e+00 : f32
    %59 = arith.subf %cst_17, %51 : f32
    %60 = vector.broadcast %59 : f32 to vector<64x128xf32>
    %61 = arith.maximumf %60, %58 : vector<64x128xf32>
    %62 = vector.broadcast %51 : f32 to vector<64x128xf32>
    %63 = arith.minimumf %62, %61 : vector<64x128xf32>
    %64 = arith.subf %58, %63 : vector<64x128xf32>
    %65 = vector.broadcast %50 : f32 to vector<64x128xf32>
    %66 = arith.mulf %65, %55 : vector<64x128xf32>
    %67 = arith.subf %48, %66 : vector<64x128xf32>
    %cst_18 = arith.constant 0.000000e+00 : f32
    %68 = arith.subf %cst_18, %51 : f32
    %69 = vector.broadcast %68 : f32 to vector<64x128xf32>
    %70 = arith.maximumf %69, %67 : vector<64x128xf32>
    %71 = vector.broadcast %51 : f32 to vector<64x128xf32>
    %72 = arith.minimumf %71, %70 : vector<64x128xf32>
    %73 = arith.subf %67, %72 : vector<64x128xf32>
    %c3_i32 = arith.constant 3 : i32
    %74 = arith.index_cast %c3_i32 : i32 to index
    %75 = memref.load %arg1[%74] : memref<8xf32, #tpu.memory_space<smem>>
    %cst_19 = arith.constant 1.000000e-01 : f32
    %76 = arith.mulf %75, %cst_19 : f32
    %cst_20 = arith.constant dense<0.000000e+00> : vector<64x128xf32>
    %77 = tpu.matmul %0, %64, %cst_20 {dimension_numbers = #tpu.dot_dimension_numbers<[1], [0], [0], [1], [0, 0, 1, 1], [], []>} : vector<64x64xf32>, vector<64x128xf32>, vector<64x128xf32> -> vector<64x128xf32>
    %78 = arith.subf %77, %4 : vector<64x128xf32>
    %cst_21 = arith.constant dense<0.000000e+00> : vector<64x128xf32>
    %79 = tpu.matmul %0, %73, %cst_21 {dimension_numbers = #tpu.dot_dimension_numbers<[1], [0], [0], [1], [0, 0, 1, 1], [], []>} : vector<64x64xf32>, vector<64x128xf32>, vector<64x128xf32> -> vector<64x128xf32>
    %80 = arith.subf %79, %5 : vector<64x128xf32>
    %81 = vector.broadcast %75 : f32 to vector<64x128xf32>
    %82 = arith.mulf %81, %78 : vector<64x128xf32>
    %83 = arith.subf %64, %82 : vector<64x128xf32>
    %cst_22 = arith.constant 0.000000e+00 : f32
    %84 = arith.subf %cst_22, %76 : f32
    %85 = vector.broadcast %84 : f32 to vector<64x128xf32>
    %86 = arith.maximumf %85, %83 : vector<64x128xf32>
    %87 = vector.broadcast %76 : f32 to vector<64x128xf32>
    %88 = arith.minimumf %87, %86 : vector<64x128xf32>
    %89 = arith.subf %83, %88 : vector<64x128xf32>
    %90 = vector.broadcast %75 : f32 to vector<64x128xf32>
    %91 = arith.mulf %90, %80 : vector<64x128xf32>
    %92 = arith.subf %73, %91 : vector<64x128xf32>
    %cst_23 = arith.constant 0.000000e+00 : f32
    %93 = arith.subf %cst_23, %76 : f32
    %94 = vector.broadcast %93 : f32 to vector<64x128xf32>
    %95 = arith.maximumf %94, %92 : vector<64x128xf32>
    %96 = vector.broadcast %76 : f32 to vector<64x128xf32>
    %97 = arith.minimumf %96, %95 : vector<64x128xf32>
    %98 = arith.subf %92, %97 : vector<64x128xf32>
    %c4_i32 = arith.constant 4 : i32
    %99 = arith.index_cast %c4_i32 : i32 to index
    %100 = memref.load %arg1[%99] : memref<8xf32, #tpu.memory_space<smem>>
    %cst_24 = arith.constant 1.000000e-01 : f32
    %101 = arith.mulf %100, %cst_24 : f32
    %cst_25 = arith.constant dense<0.000000e+00> : vector<64x128xf32>
    %102 = tpu.matmul %0, %89, %cst_25 {dimension_numbers = #tpu.dot_dimension_numbers<[1], [0], [0], [1], [0, 0, 1, 1], [], []>} : vector<64x64xf32>, vector<64x128xf32>, vector<64x128xf32> -> vector<64x128xf32>
    %103 = arith.subf %102, %4 : vector<64x128xf32>
    %cst_26 = arith.constant dense<0.000000e+00> : vector<64x128xf32>
    %104 = tpu.matmul %0, %98, %cst_26 {dimension_numbers = #tpu.dot_dimension_numbers<[1], [0], [0], [1], [0, 0, 1, 1], [], []>} : vector<64x64xf32>, vector<64x128xf32>, vector<64x128xf32> -> vector<64x128xf32>
    %105 = arith.subf %104, %5 : vector<64x128xf32>
    %106 = vector.broadcast %100 : f32 to vector<64x128xf32>
    %107 = arith.mulf %106, %103 : vector<64x128xf32>
    %108 = arith.subf %89, %107 : vector<64x128xf32>
    %cst_27 = arith.constant 0.000000e+00 : f32
    %109 = arith.subf %cst_27, %101 : f32
    %110 = vector.broadcast %109 : f32 to vector<64x128xf32>
    %111 = arith.maximumf %110, %108 : vector<64x128xf32>
    %112 = vector.broadcast %101 : f32 to vector<64x128xf32>
    %113 = arith.minimumf %112, %111 : vector<64x128xf32>
    %114 = arith.subf %108, %113 : vector<64x128xf32>
    %115 = vector.broadcast %100 : f32 to vector<64x128xf32>
    %116 = arith.mulf %115, %105 : vector<64x128xf32>
    %117 = arith.subf %98, %116 : vector<64x128xf32>
    %cst_28 = arith.constant 0.000000e+00 : f32
    %118 = arith.subf %cst_28, %101 : f32
    %119 = vector.broadcast %118 : f32 to vector<64x128xf32>
    %120 = arith.maximumf %119, %117 : vector<64x128xf32>
    %121 = vector.broadcast %101 : f32 to vector<64x128xf32>
    %122 = arith.minimumf %121, %120 : vector<64x128xf32>
    %123 = arith.subf %117, %122 : vector<64x128xf32>
    %c5_i32 = arith.constant 5 : i32
    %124 = arith.index_cast %c5_i32 : i32 to index
    %125 = memref.load %arg1[%124] : memref<8xf32, #tpu.memory_space<smem>>
    %cst_29 = arith.constant 1.000000e-01 : f32
    %126 = arith.mulf %125, %cst_29 : f32
    %cst_30 = arith.constant dense<0.000000e+00> : vector<64x128xf32>
    %127 = tpu.matmul %0, %114, %cst_30 {dimension_numbers = #tpu.dot_dimension_numbers<[1], [0], [0], [1], [0, 0, 1, 1], [], []>} : vector<64x64xf32>, vector<64x128xf32>, vector<64x128xf32> -> vector<64x128xf32>
    %128 = arith.subf %127, %4 : vector<64x128xf32>
    %cst_31 = arith.constant dense<0.000000e+00> : vector<64x128xf32>
    %129 = tpu.matmul %0, %123, %cst_31 {dimension_numbers = #tpu.dot_dimension_numbers<[1], [0], [0], [1], [0, 0, 1, 1], [], []>} : vector<64x64xf32>, vector<64x128xf32>, vector<64x128xf32> -> vector<64x128xf32>
    %130 = arith.subf %129, %5 : vector<64x128xf32>
    %131 = vector.broadcast %125 : f32 to vector<64x128xf32>
    %132 = arith.mulf %131, %128 : vector<64x128xf32>
    %133 = arith.subf %114, %132 : vector<64x128xf32>
    %cst_32 = arith.constant 0.000000e+00 : f32
    %134 = arith.subf %cst_32, %126 : f32
    %135 = vector.broadcast %134 : f32 to vector<64x128xf32>
    %136 = arith.maximumf %135, %133 : vector<64x128xf32>
    %137 = vector.broadcast %126 : f32 to vector<64x128xf32>
    %138 = arith.minimumf %137, %136 : vector<64x128xf32>
    %139 = arith.subf %133, %138 : vector<64x128xf32>
    %140 = vector.broadcast %125 : f32 to vector<64x128xf32>
    %141 = arith.mulf %140, %130 : vector<64x128xf32>
    %142 = arith.subf %123, %141 : vector<64x128xf32>
    %cst_33 = arith.constant 0.000000e+00 : f32
    %143 = arith.subf %cst_33, %126 : f32
    %144 = vector.broadcast %143 : f32 to vector<64x128xf32>
    %145 = arith.maximumf %144, %142 : vector<64x128xf32>
    %146 = vector.broadcast %126 : f32 to vector<64x128xf32>
    %147 = arith.minimumf %146, %145 : vector<64x128xf32>
    %148 = arith.subf %142, %147 : vector<64x128xf32>
    %c6_i32 = arith.constant 6 : i32
    %149 = arith.index_cast %c6_i32 : i32 to index
    %150 = memref.load %arg1[%149] : memref<8xf32, #tpu.memory_space<smem>>
    %cst_34 = arith.constant 1.000000e-01 : f32
    %151 = arith.mulf %150, %cst_34 : f32
    %cst_35 = arith.constant dense<0.000000e+00> : vector<64x128xf32>
    %152 = tpu.matmul %0, %139, %cst_35 {dimension_numbers = #tpu.dot_dimension_numbers<[1], [0], [0], [1], [0, 0, 1, 1], [], []>} : vector<64x64xf32>, vector<64x128xf32>, vector<64x128xf32> -> vector<64x128xf32>
    %153 = arith.subf %152, %4 : vector<64x128xf32>
    %cst_36 = arith.constant dense<0.000000e+00> : vector<64x128xf32>
    %154 = tpu.matmul %0, %148, %cst_36 {dimension_numbers = #tpu.dot_dimension_numbers<[1], [0], [0], [1], [0, 0, 1, 1], [], []>} : vector<64x64xf32>, vector<64x128xf32>, vector<64x128xf32> -> vector<64x128xf32>
    %155 = arith.subf %154, %5 : vector<64x128xf32>
    %156 = vector.broadcast %150 : f32 to vector<64x128xf32>
    %157 = arith.mulf %156, %153 : vector<64x128xf32>
    %158 = arith.subf %139, %157 : vector<64x128xf32>
    %cst_37 = arith.constant 0.000000e+00 : f32
    %159 = arith.subf %cst_37, %151 : f32
    %160 = vector.broadcast %159 : f32 to vector<64x128xf32>
    %161 = arith.maximumf %160, %158 : vector<64x128xf32>
    %162 = vector.broadcast %151 : f32 to vector<64x128xf32>
    %163 = arith.minimumf %162, %161 : vector<64x128xf32>
    %164 = arith.subf %158, %163 : vector<64x128xf32>
    %165 = vector.broadcast %150 : f32 to vector<64x128xf32>
    %166 = arith.mulf %165, %155 : vector<64x128xf32>
    %167 = arith.subf %148, %166 : vector<64x128xf32>
    %cst_38 = arith.constant 0.000000e+00 : f32
    %168 = arith.subf %cst_38, %151 : f32
    %169 = vector.broadcast %168 : f32 to vector<64x128xf32>
    %170 = arith.maximumf %169, %167 : vector<64x128xf32>
    %171 = vector.broadcast %151 : f32 to vector<64x128xf32>
    %172 = arith.minimumf %171, %170 : vector<64x128xf32>
    %173 = arith.subf %167, %172 : vector<64x128xf32>
    %c7_i32 = arith.constant 7 : i32
    %174 = arith.index_cast %c7_i32 : i32 to index
    %175 = memref.load %arg1[%174] : memref<8xf32, #tpu.memory_space<smem>>
    %cst_39 = arith.constant 1.000000e-01 : f32
    %176 = arith.mulf %175, %cst_39 : f32
    %cst_40 = arith.constant dense<0.000000e+00> : vector<64x128xf32>
    %177 = tpu.matmul %0, %164, %cst_40 {dimension_numbers = #tpu.dot_dimension_numbers<[1], [0], [0], [1], [0, 0, 1, 1], [], []>} : vector<64x64xf32>, vector<64x128xf32>, vector<64x128xf32> -> vector<64x128xf32>
    %178 = arith.subf %177, %4 : vector<64x128xf32>
    %cst_41 = arith.constant dense<0.000000e+00> : vector<64x128xf32>
    %179 = tpu.matmul %0, %173, %cst_41 {dimension_numbers = #tpu.dot_dimension_numbers<[1], [0], [0], [1], [0, 0, 1, 1], [], []>} : vector<64x64xf32>, vector<64x128xf32>, vector<64x128xf32> -> vector<64x128xf32>
    %180 = arith.subf %179, %5 : vector<64x128xf32>
    %181 = vector.broadcast %175 : f32 to vector<64x128xf32>
    %182 = arith.mulf %181, %178 : vector<64x128xf32>
    %183 = arith.subf %164, %182 : vector<64x128xf32>
    %cst_42 = arith.constant 0.000000e+00 : f32
    %184 = arith.subf %cst_42, %176 : f32
    %185 = vector.broadcast %184 : f32 to vector<64x128xf32>
    %186 = arith.maximumf %185, %183 : vector<64x128xf32>
    %187 = vector.broadcast %176 : f32 to vector<64x128xf32>
    %188 = arith.minimumf %187, %186 : vector<64x128xf32>
    %189 = arith.subf %183, %188 : vector<64x128xf32>
    %190 = vector.broadcast %175 : f32 to vector<64x128xf32>
    %191 = arith.mulf %190, %180 : vector<64x128xf32>
    %192 = arith.subf %173, %191 : vector<64x128xf32>
    %cst_43 = arith.constant 0.000000e+00 : f32
    %193 = arith.subf %cst_43, %176 : f32
    %194 = vector.broadcast %193 : f32 to vector<64x128xf32>
    %195 = arith.maximumf %194, %192 : vector<64x128xf32>
    %196 = vector.broadcast %176 : f32 to vector<64x128xf32>
    %197 = arith.minimumf %196, %195 : vector<64x128xf32>
    %198 = arith.subf %192, %197 : vector<64x128xf32>
    %c7_i32_44 = arith.constant 7 : i32
    %c0_45 = arith.constant 0 : index
    %c0_46 = arith.constant 0 : index
    %199 = vector.load %arg5[%c0_45, %c0_46] : memref<64x256xf32, #tpu.memory_space<vmem>>, vector<64x128xf32>
    tpu.vector_store %arg5[%c0_45, %c0_46], %189 {strides = array<i32>} : memref<64x256xf32, #tpu.memory_space<vmem>>, vector<64x128xf32>,
    %c0_47 = arith.constant 0 : index
    %c128 = arith.constant 128 : index
    %200 = vector.load %arg5[%c0_47, %c128] : memref<64x256xf32, #tpu.memory_space<vmem>>, vector<64x128xf32>
    tpu.vector_store %arg5[%c0_47, %c128], %198 {strides = array<i32>} : memref<64x256xf32, #tpu.memory_space<vmem>>, vector<64x128xf32>,
    return
  }
  func.func @transform_0(%arg0: i32, %arg1: memref<8xf32, #tpu.memory_space<smem>>) -> (i32, i32) {
    %c0_i32 = arith.constant 0 : i32
    %c0_i32_0 = arith.constant 0 : i32
    %c0_i32_1 = arith.constant 0 : i32
    return %c0_i32, %c0_i32_0 : i32, i32
  }
  func.func @transform_1(%arg0: i32, %arg1: memref<8xf32, #tpu.memory_space<smem>>) -> (i32, i32) {
    %c0_i32 = arith.constant 0 : i32
    %c0_i32_0 = arith.constant 0 : i32
    %c0_i32_1 = arith.constant 0 : i32
    return %c0_i32, %c0_i32_0 : i32, i32
  }
  func.func @transform_2(%arg0: i32, %arg1: memref<8xf32, #tpu.memory_space<smem>>) -> (i32, i32) {
    %c0_i32 = arith.constant 0 : i32
    %c0_i32_0 = arith.constant 0 : i32
    return %c0_i32, %arg0 : i32, i32
  }
  func.func @transform_3(%arg0: i32, %arg1: memref<8xf32, #tpu.memory_space<smem>>) -> (i32, i32) {
    %c0_i32 = arith.constant 0 : i32
    %c0_i32_0 = arith.constant 0 : i32
    return %c0_i32, %arg0 : i32, i32
  }
}

</mosaic_0001>

<bundles_post_ra>
// kernel: tpu_custom_call.1
= control target key start
LH: loop header
LB: loop body
LE: loop exit
PB: predicated region body
PF: predicated region fallthrough
CT: control target
= control target key end

     0   :  { %s2145_s18 = smov [#allocation3]   ;;  %s3555_s0 = inlined_call_operand.vmem [shape: f32[8], index: 0, kind: input, shape index: {}]   ;;  %s3556_s1 = inlined_call_operand.vmem [shape: f32[64,64], index: 1, kind: input, shape index: {}]   ;;  %s3557_s2 = inlined_call_operand.vmem [shape: f32[64,32], index: 2, kind: input, shape index: {}]   ;;  %s3558_s3 = inlined_call_operand.hbm [shape: f32[32,1024], index: 3, kind: input, shape index: {}]   ;;  %s3559_s4 = inlined_call_operand.hbm [shape: f32[64,1024], index: 4, kind: output, shape index: {}]  }
   0x1   :  { %s10_s17 = sshll.u32 %s3555_s0, 4  ;;  %s11_s17 = int_to_ptr.vmem [resolvable:$true] %s10_s17 }
   0x2   :  { %13 = dma.vmem_to_smem %s11_s17, 16, %s2145_s18, [#allocation2] }
   0x3   :  { %2119 = dma.done.wait [#allocation2], 16 }
   0x4   :  { %2120 = vsyncadd [#allocation2], 4294967280 }
   0x5   :  { %16 = sfence }
   0x6   :  { %17 = vsyncpa [#allocation5], 0 }
   0x7   :  { %19 = vsyncpa [#allocation5 + $0x1], 0 }
   0x8   :  { %20 = vsyncpa [#allocation6], 0 }
   0x9   :  { %22 = vsyncpa [#allocation6 + $0x1], 0  ;;  %s2180_s19 = smov 0   ;;  %s2182_s20 = smov 0  }
   0xa   :  { %s2184_s21 = smov 0   ;;  %s2186_s22 = smov 0  }
   0xb LB: > { %s2201_s0 = sadd.s32 4294967295, %s2143_s22   ;;  %s1821_s23 = sadd.s32 4294967294, %s2143_s22   ;;  %s2143_s22 = sphi %s2186_s22, %s3650_s22   ;;  %s2139_s21 = sphi %s2184_s21, %s3649_s21   ;;  %s2135_s20 = sphi %s2182_s20, %s3648_s20   ;;  %s2131_s19 = sphi %s2180_s19, %s3647_s19  }
   0xc   : > { %s2205_s24 = sadd.s32 1, %s2143_s22   ;;  %s77_s25 = sadd.s32 1, %s2139_s21 }
   0xd   : > { %s74_s26 = ssub.s32 %s2143_s22, %s2205_s24  ;;  %p84_p0 = scmp.ne.s32.totalorder %s2139_s21, %s2135_s20 }
   0xe   : > { %p75_p1 = scmp.eq.s32.totalorder %s74_s26, 0  ;;  %p85_p2 = scmp.eq.s32.totalorder %s2143_s22, 0 }
   0xf   : > { %p90_p3 = scmp.ne.s32.totalorder %s2135_s20, %s2131_s19  ;;  %p91_p4 = scmp.eq.s32.totalorder %s2201_s0, 0 }
  0x10   : > { %s2217_s27 = scalar_select %p75_p1, %s2139_s21, %s77_s25  }
  0x11   : > { %p2219_p5 = por %p85_p2, %p84_p0  ;;  %p2223_p6 = por %p91_p4, %p90_p3 }
  0x12   : > { %p114_p7 = scmp.eq.s32.totalorder %s2201_s0, 3  ;;  %p120_p8 = scmp.eq.s32.totalorder %s1821_s23, 3 }
  0x13   : > { %p1984_p9 = scmp.lt.s32.totalorder %s2143_s22, 4  ;;  %s146_s6 = sand.u32 1, %s2139_s21  }
  0x14   : > { %p2229_p10 = por %p114_p7, %p84_p0  ;;  %p2233_p11 = por %p120_p8, %p90_p3 }
  0x15   : > { %s1970_s7 = sshll.u32 %s2143_s22, 4  ;;  %s1824_s8 = sshll.u32 %s146_s6, 6 }
  0x16   : > { %s155_s11 = scalar_lea.hbm %s3558_s3, %s1970_s7  ;;  %s150_s13 = scalar_lea.vmem [#allocation4], %s1824_s8 }
  0x17   : > { %s156_s12 = sshll.u32 %s155_s11, 4  ;;  %s158_s14 = sshll.u32 %s150_s13, 4  ;;  %s157_s12 = int_to_ptr.hbm [resolvable:$true] %s156_s12  ;;  %s159_s14 = int_to_ptr.vmem [resolvable:$true] %s158_s14 }
  0x18   : > { %p2244_p12 = pnand %p1984_p9, %p2219_p5  ;;  %p1827_p13 = scmp.ge.s32.totalorder %s2143_s22, 1 }
  0x19   : > { %s147_s16 = scalar_lea.sflag [#allocation5], %s146_s6  ;;  %s2045_s17 = sshra.s32 %s157_s12, 4  ;;  %s2046_s17 = int_to_ptr.hbm [resolvable:$true] %s2045_s17 }
  0x1a   : > { %s2047_s18 = scalar_lea.hbm %s2046_s17, 64  ;;  %p2049_p1 = pneg %p2244_p12 }
  0x1b   : > { %p2048_p0 = scmp.ne.s32.totalorder %s2046_s17, %s2047_s18  ;;  %s2052_s26 = scalar_lea.hbm %s3558_s3, 256 }
  0x1c   : > { %p2053_p4 = scmp.lt.s32.totalorder %s2046_s17, %s3558_s3  ;;  %p2054_p5 = scmp.lt.s32.totalorder %s2052_s26, %s2047_s18 }
  0x1d   : > { %p2050_p2 = pnand %p2049_p1, %p2048_p0 }
  0x1e   : > { %p2055_p7 = por %p2054_p5, %p2053_p4 }
  0x1f   : > { %p2051_p3 = pneg %p2050_p2 }
  0x21   : > { %p2056_p8 = pnand %p2055_p7, %p2051_p3 }
  0x23   : > { %2059 = shalt.err (!%p2056_p8)
}
  0x24   : > { %s2146_s6 = smov 1024   ;;  %s2147_s8 = smov 256  }
  0x25   : > { %s2148_s9 = smov 16   ;;  %p166_p9 = scmp.lt.s32.totalorder %s2143_s22, 5 }
  0x26   : > { %1979 = dma.hbm_to_vmem [thread:$0]  (!%p2244_p12), %s157_s12, 1024, %s159_s14, %s147_s16, %s2146_s6, %s2147_s8, %s2148_s9  }
  0x27   : > { %p167_p0 = pnand %p1827_p13, %p166_p9 }
  0x29   : > { %170 = sbr.rel (%p167_p0) target bundleno = 1741 (0x6cd), region = 32 }
  0x2e   : > { %s2263_s10 = sand.u32 1, %s2135_s20  }
  0x2f   : > { %s1828_s11 = sshll.u32 %s2263_s10, 6  ;;  %s173_s13 = scalar_lea.sflag [#allocation5], %s2263_s10 }
  0x30   : > { %s176_s17 = scalar_lea.vmem [#allocation4], %s1828_s11 }
  0x31   : > { %2122 = dma.done.wait (%p2223_p6), %s173_s13, 1024  }
  0x32   : > { %2124 = vsyncadd (%p2223_p6), %s173_s13, 4294966272  ;;  %v224_v0 = vld [vmem:[%s176_s17 + $0x30] sm:$0xff]  ;;  %v225_v1 = vld [vmem:[%s176_s17 + $0x38] sm:$0xff]  ;;  %vm226_vm0 = vcmask 261120   ;;  %vm405_vm1 = vcmask 523264   ;;  %s1863_s16 = sld [smem:[#allocation3 + $0x2]] }
  0x33   : > { %v222_v2 = vld [vmem:[%s176_s17 + $0x20] sm:$0xff]  ;;  %263 = vmatpush.msra.mxu0 %v224_v0  ;;  %304 = vmatpush.msra.mxu1 %v225_v1  ;;  %v223_v3 = vld [vmem:[%s176_s17 + $0x28] sm:$0xff]  ;;  %v220_v4 = vld [vmem:[%s176_s17 + $0x10] sm:$0xff]  ;;  %s1880_s25 = sld [smem:[#allocation3 + $0x3]] }
  0x34   : > { %v221_v5 = vld [vmem:[%s176_s17 + $0x18] sm:$0xff]  ;;  %v218_v6 = vld [vmem:[%s176_s17] sm:$0xff]  ;;  %v219_v7 = vld [vmem:[%s176_s17 + $0x8] sm:$0xff]  ;;  %s333_s17 = sld [smem:[#allocation3]] }
  0x35   : > { %264 = vmatpush.msra.mxu0 %v222_v2  ;;  %305 = vmatpush.msra.mxu1 %v223_v3  ;;  %v210_v8 = vld [vmem:[%s3557_s2] sm:$0xff]  ;;  %v211_v9 = vld [vmem:[%s3557_s2 + $0x8] sm:$0xff]  ;;  %v212_v10 = vld [vmem:[%s3557_s2 + $0x10] sm:$0xff]  ;;  %s1897_s7 = sld [smem:[#allocation3 + $0x4]] }
  0x36   : > { %v213_v11 = vld [vmem:[%s3557_s2 + $0x18] sm:$0xff]  ;;  %v214_v12 = vld [vmem:[%s3557_s2 + $0x20] sm:$0xff]  ;;  %v215_v13 = vld [vmem:[%s3557_s2 + $0x28] sm:$0xff]  ;;  %s1931_s13 = sld [smem:[#allocation3 + $0x6]] }
  0x37   : > { %265 = vmatpush.msra.mxu0 %v220_v4  ;;  %306 = vmatpush.msra.mxu1 %v221_v5  ;;  %v216_v14 = vld [vmem:[%s3557_s2 + $0x30] sm:$0xff]  ;;  %v217_v15 = vld [vmem:[%s3557_s2 + $0x38] sm:$0xff] }
  0x38   : > { %s613_s18 = smul.f32 0.1, %s1863_s16 }
  0x39   : > { %266 = vmatpush.msra.mxu0 %v218_v6  ;;  %307 = vmatpush.msra.mxu1 %v219_v7  ;;  %s797_s26 = smul.f32 0.1, %s1880_s25 }
  0x3a   : > { %1830 = vmatmul.msk.f32.vlgmr.msra.gmra.mxu0 %vm226_vm0, %v210_v8  ;;  %1838 = vmatmul.msk.f32.vlgmr.msra.gmra.mxu1 %vm226_vm0, %v210_v8  ;;  %s334_s12 = smul.f32 0.1, %s333_s17  ;;  %v335_v30 = vstv %s333_s17  ;;  %s729_s23 = ssub.f32 0.0, %s613_s18 }
  0x3b   : > { %s913_s28 = ssub.f32 0.0, %s797_s26  ;;  %s981_s6 = smul.f32 0.1, %s1897_s7 }
  0x3c   : > { %s344_s14 = ssub.f32 0.0, %s334_s12  ;;  %v354_v44 = vstv %s334_s12  ;;  %s1349_s17 = smul.f32 0.1, %s1931_s13 }
  0x3d   : > { %s1097_s8 = ssub.f32 0.0, %s981_s6 }
  0x3e   : > { %v2347_v37 = vstv %s344_s14  ;;  %s1846_s14 = sld [smem:[#allocation3 + $0x1]] }
  0x3f   : > { %s1465_s12 = ssub.f32 0.0, %s1349_s17 }
  0x42   : > { %1831 = vmatmul.msk.f32.gmra.mxu0 %vm226_vm0, %v211_v9  ;;  %1839 = vmatmul.msk.f32.gmra.mxu1 %vm226_vm0, %v211_v9 }
  0x44   : > { %s404_s29 = smul.f32 0.1, %s1846_s14 }
  0x46   : > { %s545_s15 = ssub.f32 0.0, %s404_s29 }
  0x4a   : > { %1832 = vmatmul.msk.f32.gmra.mxu0 %vm226_vm0, %v212_v10  ;;  %1840 = vmatmul.msk.f32.gmra.mxu1 %vm226_vm0, %v212_v10 }
  0x52   : > { %1833 = vmatmul.msk.f32.gmra.mxu0 %vm226_vm0, %v213_v11  ;;  %1841 = vmatmul.msk.f32.gmra.mxu1 %vm226_vm0, %v213_v11 }
  0x5a   : > { %1834 = vmatmul.msk.f32.gmra.mxu0 %vm226_vm0, %v214_v12  ;;  %1842 = vmatmul.msk.f32.gmra.mxu1 %vm226_vm0, %v214_v12 }
  0x62   : > { %1835 = vmatmul.msk.f32.gmra.mxu0 %vm226_vm0, %v215_v13  ;;  %1843 = vmatmul.msk.f32.gmra.mxu1 %vm226_vm0, %v215_v13 }
  0x6a   : > { %1836 = vmatmul.msk.f32.gmra.mxu0 %vm226_vm0, %v216_v14  ;;  %1844 = vmatmul.msk.f32.gmra.mxu1 %vm226_vm0, %v216_v14 }
  0x72   : > { %1837 = vmatmul.msk.f32.gmra.mxu0 %vm226_vm0, %v217_v15  ;;  %1845 = vmatmul.msk.f32.gmra.mxu1 %vm226_vm0, %v217_v15 }
  0xb7   : > { %v2311_v16 = vpop.f32.mrf.mxu0  ;;  %v2313_v17 = vpop.f32.mrf.mxu1 }
  0xb8   : > { %3599 = vst [vmem:[#allocation11_spill] sm:$0xff] %v2311_v16  ;;  %v2358_v47 = vmul.f32 %v335_v30, %v2311_v16  ;;  %v371_v7 = vmul.f32 %v335_v30, %v2313_v17 }
  0xb9   : > { %3600 = vst [vmem:[#allocation12_spill] sm:$0xff] %v2313_v17 }
  0xbf   : > { %v2315_v18 = vpop.f32.mrf.mxu0  ;;  %v2317_v19 = vpop.f32.mrf.mxu1 }
  0xc0   : > { %v337_v62 = vmul.f32 %v335_v30, %v2315_v18  ;;  %v372_v63 = vmul.f32 %v335_v30, %v2317_v19 }
  0xc2   : > { %v347_v12 = vmax.f32 %v2347_v37, %v337_v62  ;;  %v380_v13 = vmax.f32 %v2347_v37, %v372_v63 }
  0xc7   : > { %v2319_v20 = vpop.f32.mrf.mxu0  ;;  %v2321_v21 = vpop.f32.mrf.mxu1 }
  0xc8   : > { %3601 = vst [vmem:[#allocation13_spill] sm:$0xff] %v2321_v21  ;;  %v338_v54 = vmul.f32 %v335_v30, %v2319_v20  ;;  %v373_v55 = vmul.f32 %v335_v30, %v2321_v21 }
  0xca   : > { %v348_v5 = vmax.f32 %v2347_v37, %v338_v54  ;;  %v381_v6 = vmax.f32 %v2347_v37, %v373_v55 }
  0xcf   : > { %v2323_v22 = vpop.f32.mrf.mxu0  ;;  %v2325_v23 = vpop.f32.mrf.mxu1 }
  0xd0   : > { %3602 = vst [vmem:[#allocation14_spill] sm:$0xff] %v2323_v22  ;;  %v339_v45 = vmul.f32 %v335_v30, %v2323_v22  ;;  %v374_v46 = vmul.f32 %v335_v30, %v2325_v23 }
  0xd1   : > { %3603 = vst [vmem:[#allocation15_spill] sm:$0xff] %v2325_v23 }
  0xd2   : > { %v349_v60 = vmax.f32 %v2347_v37, %v339_v45  ;;  %v382_v61 = vmax.f32 %v2347_v37, %v374_v46 }
  0xd4   : > { %v358_v11 = vmin.f32 %v354_v44, %v349_v60 }
  0xd7   : > { %v2327_v24 = vpop.f32.mrf.mxu0  ;;  %v2329_v25 = vpop.f32.mrf.mxu1 }
  0xd8   : > { %3604 = vst [vmem:[#allocation16_spill] sm:$0xff] %v2327_v24  ;;  %v340_v38 = vmul.f32 %v335_v30, %v2327_v24  ;;  %v375_v39 = vmul.f32 %v335_v30, %v2329_v25 }
  0xd9   : > { %3605 = vst [vmem:[#allocation17_spill] sm:$0xff] %v2329_v25 }
  0xda   : > { %v350_v52 = vmax.f32 %v2347_v37, %v340_v38  ;;  %v383_v53 = vmax.f32 %v2347_v37, %v375_v39 }
  0xdc   : > { %v359_v4 = vmin.f32 %v354_v44, %v350_v52  ;;  %v391_v10 = vmin.f32 %v354_v44, %v383_v53  ;;  %v2450_v53 = vld [vmem:[%s3556_s1 + $0x10] sm:$0xff] }
  0xdf   : > { %v2331_v26 = vpop.f32.mrf.mxu0  ;;  %v2333_v27 = vpop.f32.mrf.mxu1 }
  0xe0   : > { %3606 = vst [vmem:[#allocation18_spill] sm:$0xff] %v2331_v26  ;;  %v341_v33 = vmul.f32 %v335_v30, %v2331_v26  ;;  %v376_v34 = vmul.f32 %v335_v30, %v2333_v27 }
  0xe1   : > { %3607 = vst [vmem:[#allocation19_spill] sm:$0xff] %v2333_v27 }
  0xe2   : > { %v351_v50 = vmax.f32 %v2347_v37, %v341_v33  ;;  %v384_v51 = vmax.f32 %v2347_v37, %v376_v34 }
  0xe4   : > { %v360_v2 = vmin.f32 %v354_v44, %v351_v50  ;;  %v392_v3 = vmin.f32 %v354_v44, %v384_v51 }
  0xe6   : > { %v2389_v14 = vsub.f32 %v341_v33, %v360_v2  ;;  %v2391_v15 = vsub.f32 %v376_v34, %v392_v3  ;;  %v356_v33 = vmin.f32 %v354_v44, %v347_v12  ;;  %v2404_v34 = vsub.f32 %v339_v45, %v358_v11 }
  0xe7   : > { %v2335_v28 = vpop.f32.mrf.mxu0  ;;  %v2337_v29 = vpop.f32.mrf.mxu1  ;;  %v528_v12 = vstv %s1846_s14  ;;  %s1948_s14 = sld [smem:[#allocation3 + $0x7]] }
  0xe8   : > { %3608 = vst [vmem:[#allocation20_spill] sm:$0xff] %v2335_v28  ;;  %v342_v31 = vmul.f32 %v335_v30, %v2335_v28  ;;  %v377_v32 = vmul.f32 %v335_v30, %v2337_v29  ;;  %v2416_v51 = vsub.f32 %v337_v62, %v356_v33 }
  0xe9   : > { %3609 = vst [vmem:[#allocation21_spill] sm:$0xff] %v2337_v29 }
  0xea   : > { %v352_v42 = vmax.f32 %v2347_v37, %v342_v31  ;;  %v385_v43 = vmax.f32 %v2347_v37, %v377_v32 }
  0xec   : > { %v361_v58 = vmin.f32 %v354_v44, %v352_v42  ;;  %v393_v59 = vmin.f32 %v354_v44, %v385_v43  ;;  %v2400_v42 = vsub.f32 %v375_v39, %v391_v10  ;;  %v389_v43 = vmin.f32 %v354_v44, %v381_v6 }
  0xee   : > { %v2381_v8 = vsub.f32 %v342_v31, %v361_v58  ;;  %v2383_v9 = vsub.f32 %v377_v32, %v393_v59  ;;  %v346_v31 = vmax.f32 %v2347_v37, %v2358_v47  ;;  %v379_v32 = vmax.f32 %v2347_v37, %v371_v7  ;;  %v2495_v58 = vld [vmem:[%s3556_s1 + $0x38] sm:$0xff] }
  0xef   : > { %v2343_v35 = vpop.f32.mrf.mxu0  ;;  %v2345_v36 = vpop.f32.mrf.mxu1  ;;  %v2412_v39 = vsub.f32 %v373_v55, %v389_v43  ;;  %v2468_v55 = vld [vmem:[%s3556_s1 + $0x20] sm:$0xff]  ;;  %3610 = vst [vmem:[#allocation22_spill] sm:$0xff] %v2495_v58 }
  0xf0   : > { %v343_v40 = vmul.f32 %v335_v30, %v2343_v35  ;;  %v378_v41 = vmul.f32 %v335_v30, %v2345_v36  ;;  %v390_v30 = vmin.f32 %v354_v44, %v382_v61  ;;  %v387_v50 = vmin.f32 %v354_v44, %v379_v32 }
  0xf2   : > { %v353_v48 = vmax.f32 %v2347_v37, %v343_v40  ;;  %v386_v49 = vmax.f32 %v2347_v37, %v378_v41  ;;  %v355_v37 = vmin.f32 %v354_v44, %v346_v31  ;;  %v2425_v52 = vsub.f32 %v371_v7, %v387_v50 }
  0xf4   : > { %v362_v56 = vmin.f32 %v354_v44, %v353_v48  ;;  %v394_v57 = vmin.f32 %v354_v44, %v386_v49  ;;  %v2406_v48 = vsub.f32 %v374_v46, %v390_v30  ;;  %v388_v49 = vmin.f32 %v354_v44, %v380_v13 }
  0xf5   : > { %v2423_v46 = vsub.f32 %v2358_v47, %v355_v37  ;;  %v2441_v47 = vld [vmem:[%s3556_s1 + $0x8] sm:$0xff] }
  0xf6   : > { %v2372_v0 = vsub.f32 %v343_v40, %v362_v56  ;;  %v2374_v1 = vsub.f32 %v378_v41, %v394_v57  ;;  %v357_v40 = vmin.f32 %v354_v44, %v348_v5  ;;  %v2398_v41 = vsub.f32 %v340_v38, %v359_v4  ;;  %v2430_v44 = vld [vmem:[%s3556_s1] sm:$0xff]  ;;  %v2477_v56 = vld [vmem:[%s3556_s1 + $0x28] sm:$0xff]  ;;  %v2486_v57 = vld [vmem:[%s3556_s1 + $0x30] sm:$0xff] }
  0xf7   : > { %v2418_v45 = vsub.f32 %v372_v63, %v388_v49 }
  0xf8   : > { %438 = vmatpush.msra.mxu2 %v2372_v0  ;;  %487 = vmatpush.msra.mxu3 %v2374_v1  ;;  %v2410_v38 = vsub.f32 %v338_v54, %v357_v40  ;;  %v2459_v54 = vld [vmem:[%s3556_s1 + $0x18] sm:$0xff] }
  0xfa   : > { %439 = vmatpush.msra.mxu2 %v2381_v8  ;;  %488 = vmatpush.msra.mxu3 %v2383_v9 }
  0xfc   : > { %440 = vmatpush.msra.mxu2 %v2389_v14  ;;  %489 = vmatpush.msra.mxu3 %v2391_v15 }
  0xfe   : > { %441 = vmatpush.msra.mxu2 %v2398_v41  ;;  %490 = vmatpush.msra.mxu3 %v2400_v42 }
 0x100   : > { %442 = vmatpush.msra.mxu2 %v2404_v34  ;;  %491 = vmatpush.msra.mxu3 %v2406_v48 }
 0x102   : > { %443 = vmatpush.msra.mxu2 %v2410_v38  ;;  %492 = vmatpush.msra.mxu3 %v2412_v39 }
 0x104   : > { %444 = vmatpush.msra.mxu2 %v2416_v51  ;;  %493 = vmatpush.msra.mxu3 %v2418_v45 }
 0x106   : > { %445 = vmatpush.msra.mxu2 %v2423_v46  ;;  %494 = vmatpush.msra.mxu3 %v2425_v52 }
 0x107   : > { %1847 = vmatmul.msk.f32.vlgmr.msra.gmra.mxu2 %vm405_vm1, %v2430_v44  ;;  %1855 = vmatmul.msk.f32.vlgmr.msra.gmra.mxu3 %vm405_vm1, %v2430_v44 }
 0x10f   : > { %1848 = vmatmul.msk.f32.gmra.mxu2 %vm405_vm1, %v2441_v47  ;;  %1856 = vmatmul.msk.f32.gmra.mxu3 %vm405_vm1, %v2441_v47 }
 0x117   : > { %1849 = vmatmul.msk.f32.gmra.mxu2 %vm405_vm1, %v2450_v53  ;;  %1857 = vmatmul.msk.f32.gmra.mxu3 %vm405_vm1, %v2450_v53 }
 0x11f   : > { %1850 = vmatmul.msk.f32.gmra.mxu2 %vm405_vm1, %v2459_v54  ;;  %1858 = vmatmul.msk.f32.gmra.mxu3 %vm405_vm1, %v2459_v54 }
 0x127   : > { %1851 = vmatmul.msk.f32.gmra.mxu2 %vm405_vm1, %v2468_v55  ;;  %1859 = vmatmul.msk.f32.gmra.mxu3 %vm405_vm1, %v2468_v55 }
 0x12f   : > { %1852 = vmatmul.msk.f32.gmra.mxu2 %vm405_vm1, %v2477_v56  ;;  %1860 = vmatmul.msk.f32.gmra.mxu3 %vm405_vm1, %v2477_v56 }
 0x137   : > { %1853 = vmatmul.msk.f32.gmra.mxu2 %vm405_vm1, %v2486_v57  ;;  %1861 = vmatmul.msk.f32.gmra.mxu3 %vm405_vm1, %v2486_v57 }
 0x13f   : > { %1854 = vmatmul.msk.f32.gmra.mxu2 %vm405_vm1, %v2495_v58  ;;  %1862 = vmatmul.msk.f32.gmra.mxu3 %vm405_vm1, %v2495_v58 }
 0x18a   : > { %v447_v59 = vpop.f32.mrf.mxu2  ;;  %v496_v60 = vpop.f32.mrf.mxu3 }
 0x18b   : > { %v471_v11 = vsub.f32 %v447_v59, %v2311_v16  ;;  %v520_v43 = vsub.f32 %v496_v60, %v2313_v17 }
 0x18d   : > { %v529_v32 = vmul.f32 %v528_v12, %v471_v11  ;;  %v572_v11 = vmul.f32 %v528_v12, %v520_v43 }
 0x192   : > { %v450_v61 = vpop.f32.mrf.mxu2  ;;  %v499_v62 = vpop.f32.mrf.mxu3 }
 0x19a   : > { %v453_v63 = vpop.f32.mrf.mxu2  ;;  %v502_v2 = vpop.f32.mrf.mxu3 }
 0x1a2   : > { %v456_v3 = vpop.f32.mrf.mxu2  ;;  %v505_v4 = vpop.f32.mrf.mxu3 }
 0x1a3   : > { %v474_v58 = vsub.f32 %v456_v3, %v2323_v22 }
 0x1aa   : > { %v459_v5 = vpop.f32.mrf.mxu2  ;;  %v508_v6 = vpop.f32.mrf.mxu3 }
 0x1ab   : > { %v475_v37 = vsub.f32 %v459_v5, %v2327_v24  ;;  %v524_v50 = vsub.f32 %v508_v6, %v2329_v25  ;;  %v473_v5 = vsub.f32 %v453_v63, %v2319_v20  ;;  %v522_v6 = vsub.f32 %v502_v2, %v2321_v21 }
 0x1ad   : > { %v531_v21 = vmul.f32 %v528_v12, %v473_v5 }
 0x1b2   : > { %v462_v7 = vpop.f32.mrf.mxu2  ;;  %v511_v10 = vpop.f32.mrf.mxu3 }
 0x1b3   : > { %v476_v33 = vsub.f32 %v462_v7, %v2331_v26  ;;  %v525_v49 = vsub.f32 %v511_v10, %v2333_v27  ;;  %v2516_v7 = vsub.f32 %v2423_v46, %v529_v32  ;;  %v533_v10 = vmul.f32 %v528_v12, %v475_v37 }
 0x1b4   : > { %v521_v46 = vsub.f32 %v499_v62, %v2317_v19  ;;  %v532_v32 = vmul.f32 %v528_v12, %v474_v58 }
 0x1b5   : > { %v534_v60 = vmul.f32 %v528_v12, %v476_v33  ;;  %v577_v17 = vmul.f32 %v528_v12, %v525_v49  ;;  %v472_v33 = vsub.f32 %v450_v61, %v2315_v18 }
 0x1b7   : > { %v542_v37 = vsub.f32 %v2389_v14, %v534_v60  ;;  %v530_v62 = vmul.f32 %v528_v12, %v472_v33  ;;  %v540_v14 = vsub.f32 %v2404_v34, %v532_v32 }
 0x1ba   : > { %v465_v13 = vpop.f32.mrf.mxu2  ;;  %v514_v30 = vpop.f32.mrf.mxu3 }
 0x1bb   : > { %v477_v40 = vsub.f32 %v465_v13, %v2335_v28  ;;  %v526_v31 = vsub.f32 %v514_v30, %v2337_v29  ;;  %v523_v13 = vsub.f32 %v505_v4, %v2325_v23  ;;  %v2511_v28 = vstv %s545_s15 }
 0x1bc   : > { %v2513_v30 = vstv %s404_s29  ;;  %s1533_s29 = smul.f32 0.1, %s1948_s14 }
 0x1bd   : > { %v535_v59 = vmul.f32 %v528_v12, %v477_v40  ;;  %v578_v16 = vmul.f32 %v528_v12, %v526_v31  ;;  %v576_v40 = vmul.f32 %v528_v12, %v524_v50  ;;  %v575_v63 = vmul.f32 %v528_v12, %v523_v13 }
 0x1be   : > { %v585_v50 = vsub.f32 %v2391_v15, %v577_v17  ;;  %v539_v13 = vsub.f32 %v2410_v38, %v531_v21  ;;  %s1649_s15 = ssub.f32 0.0, %s1533_s29 }
 0x1bf   : > { %v543_v22 = vsub.f32 %v2381_v8, %v535_v59  ;;  %v586_v43 = vsub.f32 %v2383_v9, %v578_v16  ;;  %v584_v8 = vsub.f32 %v2400_v42, %v576_v40  ;;  %v583_v17 = vsub.f32 %v2406_v48, %v575_v63 }
 0x1c0   : > { %v552_v42 = vmax.f32 %v2511_v28, %v542_v37  ;;  %v538_v40 = vsub.f32 %v2416_v51, %v530_v62  ;;  %v549_v32 = vmax.f32 %v2511_v28, %v539_v13 }
 0x1c1   : > { %v553_v61 = vmax.f32 %v2511_v28, %v543_v22  ;;  %v594_v58 = vmax.f32 %v2511_v28, %v586_v43  ;;  %v592_v59 = vmax.f32 %v2511_v28, %v584_v8 }
 0x1c2   : > { %v468_v31 = vpop.f32.mrf.mxu2  ;;  %v517_v3 = vpop.f32.mrf.mxu3  ;;  %v561_v38 = vmin.f32 %v2513_v30, %v552_v42 }
 0x1c3   : > { %v478_v4 = vsub.f32 %v468_v31, %v2343_v35  ;;  %v527_v23 = vsub.f32 %v517_v3, %v2345_v36  ;;  %v574_v31 = vmul.f32 %v528_v12, %v522_v6  ;;  %v541_v3 = vsub.f32 %v2398_v41, %v533_v10 }
 0x1c4   : > { %v562_v60 = vmin.f32 %v2513_v30, %v553_v61  ;;  %v602_v5 = vmin.f32 %v2513_v30, %v594_v58  ;;  %v550_v6 = vmax.f32 %v2511_v28, %v540_v14  ;;  %v591_v10 = vmax.f32 %v2511_v28, %v583_v17 }
 0x1c5   : > { %v536_v49 = vmul.f32 %v528_v12, %v478_v4  ;;  %v579_v2 = vmul.f32 %v528_v12, %v527_v23  ;;  %v573_v23 = vmul.f32 %v528_v12, %v521_v46  ;;  %v582_v12 = vsub.f32 %v2412_v39, %v574_v31 }
 0x1c6   : > { %v2564_v51 = vsub.f32 %v543_v22, %v562_v60  ;;  %v559_v31 = vmin.f32 %v2513_v30, %v550_v6  ;;  %v599_v22 = vmin.f32 %v2513_v30, %v591_v10  ;;  %v547_v61 = vmax.f32 %v2511_v28, %v2516_v7 }
 0x1c7   : > { %v544_v16 = vsub.f32 %v2372_v0, %v536_v49  ;;  %v587_v9 = vsub.f32 %v2374_v1, %v579_v2  ;;  %v593_v0 = vmax.f32 %v2511_v28, %v585_v50  ;;  %v551_v1 = vmax.f32 %v2511_v28, %v541_v3 }
 0x1c8   : > { %v581_v4 = vsub.f32 %v2418_v45, %v573_v23  ;;  %v590_v63 = vmax.f32 %v2511_v28, %v582_v12  ;;  %v580_v49 = vsub.f32 %v2425_v52, %v572_v11  ;;  %v2566_v45 = vsub.f32 %v586_v43, %v602_v5 }
 0x1c9   : > { %v554_v15 = vmax.f32 %v2511_v28, %v544_v16  ;;  %v595_v41 = vmax.f32 %v2511_v28, %v587_v9  ;;  %v601_v39 = vmin.f32 %v2513_v30, %v593_v0  ;;  %v560_v46 = vmin.f32 %v2513_v30, %v551_v1 }
 0x1ca   : > { %v600_v2 = vmin.f32 %v2513_v30, %v592_v59  ;;  %v2574_v52 = vsub.f32 %v542_v37, %v561_v38  ;;  %v558_v43 = vmin.f32 %v2513_v30, %v549_v32  ;;  %v588_v58 = vmax.f32 %v2511_v28, %v580_v49 }
 0x1cb   : > { %v563_v34 = vmin.f32 %v2513_v30, %v554_v15  ;;  %v603_v48 = vmin.f32 %v2513_v30, %v595_v41  ;;  %v2576_v11 = vsub.f32 %v585_v50, %v601_v39  ;;  %v2585_v62 = vsub.f32 %v541_v3, %v560_v46  ;;  %v3612_v39 = vld [vmem:[#allocation11_spill] sm:$0xff] }
 0x1cc   : > { %v2587_v23 = vsub.f32 %v584_v8, %v600_v2  ;;  %v598_v37 = vmin.f32 %v2513_v30, %v590_v63  ;;  %v2593_v15 = vsub.f32 %v540_v14, %v559_v31  ;;  %v2595_v41 = vsub.f32 %v583_v17, %v599_v22  ;;  %v3613_v2 = vld [vmem:[#allocation20_spill] sm:$0xff] }
 0x1cd   : > { %v2552_v33 = vsub.f32 %v544_v16, %v563_v34  ;;  %v2554_v21 = vsub.f32 %v587_v9, %v603_v48  ;;  %v548_v16 = vmax.f32 %v2511_v28, %v538_v40  ;;  %v589_v9 = vmax.f32 %v2511_v28, %v581_v4  ;;  %v3614_v22 = vld [vmem:[#allocation12_spill] sm:$0xff] }
 0x1ce   : > { %v556_v42 = vmin.f32 %v2513_v30, %v547_v61  ;;  %v2601_v3 = vsub.f32 %v539_v13, %v558_v43  ;;  %v2603_v8 = vsub.f32 %v582_v12, %v598_v37  ;;  %v596_v0 = vmin.f32 %v2513_v30, %v588_v58 }
 0x1cf   : > { %622 = vmatpush.msrb.mxu0 %v2552_v33  ;;  %671 = vmatpush.msrb.mxu1 %v2554_v21  ;;  %v557_v50 = vmin.f32 %v2513_v30, %v548_v16  ;;  %v597_v28 = vmin.f32 %v2513_v30, %v589_v9  ;;  %v3611_v30 = vld [vmem:[#allocation22_spill] sm:$0xff]  ;;  %v712_v32 = vstv %s1863_s16  ;;  %s1829_s16 = sshll.u32 %s2263_s10, 7 }
 0x1d0   : > { %v564_v1 = vsub.f32 %v2516_v7, %v556_v42  ;;  %v2615_v59 = vsub.f32 %v580_v49, %v596_v0  ;;  %v3615_v0 = vld [vmem:[#allocation14_spill] sm:$0xff] }
 0x1d1   : > { %623 = vmatpush.msrb.mxu0 %v2564_v51  ;;  %672 = vmatpush.msrb.mxu1 %v2566_v45  ;;  %v2608_v14 = vsub.f32 %v538_v40, %v557_v50  ;;  %v2610_v17 = vsub.f32 %v581_v4, %v597_v28 }
 0x1d3   : > { %624 = vmatpush.msrb.mxu0 %v2574_v52  ;;  %673 = vmatpush.msrb.mxu1 %v2576_v11 }
 0x1d5   : > { %625 = vmatpush.msrb.mxu0 %v2585_v62  ;;  %674 = vmatpush.msrb.mxu1 %v2587_v23 }
 0x1d7   : > { %626 = vmatpush.msrb.mxu0 %v2593_v15  ;;  %675 = vmatpush.msrb.mxu1 %v2595_v41 }
 0x1d9   : > { %627 = vmatpush.msrb.mxu0 %v2601_v3  ;;  %676 = vmatpush.msrb.mxu1 %v2603_v8 }
 0x1db   : > { %628 = vmatpush.msrb.mxu0 %v2608_v14  ;;  %677 = vmatpush.msrb.mxu1 %v2610_v17 }
 0x1dd   : > { %629 = vmatpush.msrb.mxu0 %v564_v1  ;;  %678 = vmatpush.msrb.mxu1 %v2615_v59 }
 0x1de   : > { %1864 = vmatmul.msk.f32.vlgmr.msrb.gmra.mxu0 %vm405_vm1, %v2430_v44  ;;  %1872 = vmatmul.msk.f32.vlgmr.msrb.gmra.mxu1 %vm405_vm1, %v2430_v44 }
 0x1e6   : > { %1865 = vmatmul.msk.f32.gmra.mxu0 %vm405_vm1, %v2441_v47  ;;  %1873 = vmatmul.msk.f32.gmra.mxu1 %vm405_vm1, %v2441_v47 }
 0x1ee   : > { %1866 = vmatmul.msk.f32.gmra.mxu0 %vm405_vm1, %v2450_v53  ;;  %1874 = vmatmul.msk.f32.gmra.mxu1 %vm405_vm1, %v2450_v53 }
 0x1f6   : > { %1867 = vmatmul.msk.f32.gmra.mxu0 %vm405_vm1, %v2459_v54  ;;  %1875 = vmatmul.msk.f32.gmra.mxu1 %vm405_vm1, %v2459_v54 }
 0x1fe   : > { %1868 = vmatmul.msk.f32.gmra.mxu0 %vm405_vm1, %v2468_v55  ;;  %1876 = vmatmul.msk.f32.gmra.mxu1 %vm405_vm1, %v2468_v55 }
 0x206   : > { %1869 = vmatmul.msk.f32.gmra.mxu0 %vm405_vm1, %v2477_v56  ;;  %1877 = vmatmul.msk.f32.gmra.mxu1 %vm405_vm1, %v2477_v56 }
 0x20e   : > { %1870 = vmatmul.msk.f32.gmra.mxu0 %vm405_vm1, %v2486_v57  ;;  %1878 = vmatmul.msk.f32.gmra.mxu1 %vm405_vm1, %v2486_v57 }
 0x216   : > { %1871 = vmatmul.msk.f32.gmra.mxu0 %vm405_vm1, %v3611_v30  ;;  %1879 = vmatmul.msk.f32.gmra.mxu1 %vm405_vm1, %v3611_v30 }
 0x25b   : > { %v631_v7 = vpop.f32.mrf.mxu0  ;;  %v680_v13 = vpop.f32.mrf.mxu1 }
 0x25c   : > { %v655_v46 = vsub.f32 %v631_v7, %v3612_v39  ;;  %v704_v43 = vsub.f32 %v680_v13, %v3614_v22  ;;  %v3616_v39 = vld [vmem:[#allocation15_spill] sm:$0xff] }
 0x25e   : > { %v713_v9 = vmul.f32 %v712_v32, %v655_v46  ;;  %v756_v46 = vmul.f32 %v712_v32, %v704_v43 }
 0x263   : > { %v634_v12 = vpop.f32.mrf.mxu0  ;;  %v683_v34 = vpop.f32.mrf.mxu1 }
 0x26b   : > { %v637_v48 = vpop.f32.mrf.mxu0  ;;  %v686_v60 = vpop.f32.mrf.mxu1 }
 0x273   : > { %v640_v5 = vpop.f32.mrf.mxu0  ;;  %v689_v6 = vpop.f32.mrf.mxu1 }
 0x274   : > { %v658_v7 = vsub.f32 %v640_v5, %v3615_v0 }
 0x27b   : > { %v643_v10 = vpop.f32.mrf.mxu0  ;;  %v692_v40 = vpop.f32.mrf.mxu1 }
 0x27c   : > { %v659_v37 = vsub.f32 %v643_v10, %v2327_v24  ;;  %v708_v50 = vsub.f32 %v692_v40, %v2329_v25  ;;  %v3617_v10 = vld [vmem:[#allocation13_spill] sm:$0xff] }
 0x27d   : > { %v706_v24 = vsub.f32 %v686_v60, %v3617_v10 }
 0x27e   : > { %v717_v40 = vmul.f32 %v712_v32, %v659_v37 }
 0x283   : > { %v646_v4 = vpop.f32.mrf.mxu0  ;;  %v695_v38 = vpop.f32.mrf.mxu1 }
 0x284   : > { %v660_v61 = vsub.f32 %v646_v4, %v2331_v26  ;;  %v709_v58 = vsub.f32 %v695_v38, %v2333_v27  ;;  %v2664_v4 = vsub.f32 %v564_v1, %v713_v9  ;;  %v657_v38 = vsub.f32 %v637_v48, %v2319_v20 }
 0x285   : > { %v705_v1 = vsub.f32 %v683_v34, %v2317_v19  ;;  %v716_v9 = vmul.f32 %v712_v32, %v658_v7 }
 0x286   : > { %v718_v13 = vmul.f32 %v712_v32, %v660_v61  ;;  %v761_v22 = vmul.f32 %v712_v32, %v709_v58  ;;  %v656_v61 = vsub.f32 %v634_v12, %v2315_v18  ;;  %v715_v10 = vmul.f32 %v712_v32, %v657_v38 }
 0x287   : > { %v757_v7 = vmul.f32 %v712_v32, %v705_v1 }
 0x288   : > { %v726_v37 = vsub.f32 %v2574_v52, %v718_v13  ;;  %v724_v52 = vsub.f32 %v2593_v15, %v716_v9 }
 0x28b   : > { %v649_v63 = vpop.f32.mrf.mxu0  ;;  %v698_v49 = vpop.f32.mrf.mxu1 }
 0x28c   : > { %v661_v31 = vsub.f32 %v649_v63, %v3613_v2  ;;  %v710_v16 = vsub.f32 %v698_v49, %v2337_v29  ;;  %v707_v63 = vsub.f32 %v689_v6, %v3616_v39  ;;  %v2660_v2 = vstv %s729_s23  ;;  %s1971_s23 = sshll.u32 %s2201_s0, 4 }
 0x28d   : > { %v2662_v49 = vstv %s613_s18  ;;  %s3440_s18 = scalar_lea.vmem [#allocation7], %s1829_s16 }
 0x28e   : > { %v719_v28 = vmul.f32 %v712_v32, %v661_v31  ;;  %v762_v42 = vmul.f32 %v712_v32, %v710_v16  ;;  %v760_v31 = vmul.f32 %v712_v32, %v708_v50  ;;  %v759_v48 = vmul.f32 %v712_v32, %v707_v63  ;;  %s1745_s0 = sshll.u32 %s3440_s18, 4  ;;  %s1746_s0 = int_to_ptr.vmem [resolvable:$true] %s1745_s0 }
 0x28f   : > { %v769_v50 = vsub.f32 %v2576_v11, %v761_v22  ;;  %v723_v63 = vsub.f32 %v2601_v3, %v715_v10 }
 0x290   : > { %v727_v39 = vsub.f32 %v2564_v51, %v719_v28  ;;  %v770_v43 = vsub.f32 %v2566_v45, %v762_v42  ;;  %v768_v51 = vsub.f32 %v2587_v23, %v760_v31  ;;  %v714_v42 = vmul.f32 %v712_v32, %v656_v61 }
 0x291   : > { %v767_v11 = vsub.f32 %v2595_v41, %v759_v48  ;;  %v736_v23 = vmax.f32 %v2660_v2, %v726_v37  ;;  %v733_v9 = vmax.f32 %v2660_v2, %v723_v63 }
 0x292   : > { %v737_v34 = vmax.f32 %v2660_v2, %v727_v39  ;;  %v778_v28 = vmax.f32 %v2660_v2, %v770_v43  ;;  %v776_v22 = vmax.f32 %v2660_v2, %v768_v51 }
 0x293   : > { %v652_v16 = vpop.f32.mrf.mxu0  ;;  %v701_v25 = vpop.f32.mrf.mxu1  ;;  %v775_v31 = vmax.f32 %v2660_v2, %v767_v11 }
 0x294   : > { %v662_v5 = vsub.f32 %v652_v16, %v2343_v35  ;;  %v711_v6 = vsub.f32 %v701_v25, %v2345_v36  ;;  %v758_v16 = vmul.f32 %v712_v32, %v706_v24  ;;  %v725_v25 = vsub.f32 %v2585_v62, %v717_v40 }
 0x295   : > { %v746_v13 = vmin.f32 %v2662_v49, %v737_v34  ;;  %v786_v38 = vmin.f32 %v2662_v49, %v778_v28  ;;  %v734_v40 = vmax.f32 %v2660_v2, %v724_v52  ;;  %v731_v34 = vmax.f32 %v2660_v2, %v2664_v4 }
 0x296   : > { %v720_v58 = vmul.f32 %v712_v32, %v662_v5  ;;  %v763_v60 = vmul.f32 %v712_v32, %v711_v6  ;;  %v766_v32 = vsub.f32 %v2603_v8, %v758_v16  ;;  %v722_v5 = vsub.f32 %v2608_v14, %v714_v42 }
 0x297   : > { %v765_v6 = vsub.f32 %v2610_v17, %v757_v7  ;;  %v745_v8 = vmin.f32 %v2662_v49, %v736_v23  ;;  %v2712_v14 = vsub.f32 %v727_v39, %v746_v13  ;;  %v2714_v17 = vsub.f32 %v770_v43, %v786_v38 }
 0x298   : > { %v728_v45 = vsub.f32 %v2552_v33, %v720_v58  ;;  %v771_v12 = vsub.f32 %v2554_v21, %v763_v60  ;;  %v777_v33 = vmax.f32 %v2660_v2, %v769_v50  ;;  %v735_v21 = vmax.f32 %v2660_v2, %v725_v25 }
 0x299   : > { %v774_v48 = vmax.f32 %v2660_v2, %v766_v32  ;;  %v764_v58 = vsub.f32 %v2615_v59, %v756_v46  ;;  %v784_v60 = vmin.f32 %v2662_v49, %v776_v22  ;;  %v743_v16 = vmin.f32 %v2662_v49, %v734_v40 }
 0x29a   : > { %v738_v24 = vmax.f32 %v2660_v2, %v728_v45  ;;  %v779_v62 = vmax.f32 %v2660_v2, %v771_v12  ;;  %v785_v10 = vmin.f32 %v2662_v49, %v777_v33  ;;  %v744_v1 = vmin.f32 %v2662_v49, %v735_v21 }
 0x29b   : > { %v2722_v59 = vsub.f32 %v726_v37, %v745_v8  ;;  %v783_v39 = vmin.f32 %v2662_v49, %v775_v31  ;;  %v742_v43 = vmin.f32 %v2662_v49, %v733_v9  ;;  %v772_v28 = vmax.f32 %v2660_v2, %v764_v58  ;;  %v3618_v8 = vld [vmem:[#allocation11_spill] sm:$0xff] }
 0x29c   : > { %v747_v15 = vmin.f32 %v2662_v49, %v738_v24  ;;  %v787_v41 = vmin.f32 %v2662_v49, %v779_v62  ;;  %v2724_v46 = vsub.f32 %v769_v50, %v785_v10  ;;  %v2733_v42 = vsub.f32 %v725_v25, %v744_v1 }
 0x29d   : > { %v2735_v7 = vsub.f32 %v768_v51, %v784_v60  ;;  %v782_v37 = vmin.f32 %v2662_v49, %v774_v48  ;;  %v2741_v24 = vsub.f32 %v724_v52, %v743_v16  ;;  %v2743_v62 = vsub.f32 %v767_v11, %v783_v39 }
 0x29e   : > { %v2700_v61 = vsub.f32 %v728_v45, %v747_v15  ;;  %v2702_v3 = vsub.f32 %v771_v12, %v787_v41  ;;  %v732_v45 = vmax.f32 %v2660_v2, %v722_v5  ;;  %v773_v12 = vmax.f32 %v2660_v2, %v765_v6 }
 0x29f   : > { %v740_v23 = vmin.f32 %v2662_v49, %v731_v34  ;;  %v2749_v25 = vsub.f32 %v723_v63, %v742_v43  ;;  %v2751_v51 = vsub.f32 %v766_v32, %v782_v37  ;;  %v780_v33 = vmin.f32 %v2662_v49, %v772_v28  ;;  %v3621_v28 = vld [vmem:[#allocation16_spill] sm:$0xff] }
 0x2a0   : > { %806 = vmatpush.msrb.mxu2 %v2700_v61  ;;  %855 = vmatpush.msrb.mxu3 %v2702_v3  ;;  %v741_v50 = vmin.f32 %v2662_v49, %v732_v45  ;;  %v781_v2 = vmin.f32 %v2662_v49, %v773_v12  ;;  %v896_v1 = vstv %s1880_s25  ;;  %v3620_v12 = vld [vmem:[#allocation12_spill] sm:$0xff] }
 0x2a1   : > { %v748_v21 = vsub.f32 %v2664_v4, %v740_v23  ;;  %v2763_v22 = vsub.f32 %v764_v58, %v780_v33  ;;  %v3619_v58 = vld [vmem:[#allocation20_spill] sm:$0xff] }
 0x2a2   : > { %807 = vmatpush.msrb.mxu2 %v2712_v14  ;;  %856 = vmatpush.msrb.mxu3 %v2714_v17  ;;  %v2756_v52 = vsub.f32 %v722_v5, %v741_v50  ;;  %v2758_v11 = vsub.f32 %v765_v6, %v781_v2  ;;  %v3622_v50 = vld [vmem:[#allocation17_spill] sm:$0xff] }
 0x2a4   : > { %808 = vmatpush.msrb.mxu2 %v2722_v59  ;;  %857 = vmatpush.msrb.mxu3 %v2724_v46 }
 0x2a6   : > { %809 = vmatpush.msrb.mxu2 %v2733_v42  ;;  %858 = vmatpush.msrb.mxu3 %v2735_v7 }
 0x2a8   : > { %810 = vmatpush.msrb.mxu2 %v2741_v24  ;;  %859 = vmatpush.msrb.mxu3 %v2743_v62 }
 0x2aa   : > { %811 = vmatpush.msrb.mxu2 %v2749_v25  ;;  %860 = vmatpush.msrb.mxu3 %v2751_v51 }
 0x2ac   : > { %812 = vmatpush.msrb.mxu2 %v2756_v52  ;;  %861 = vmatpush.msrb.mxu3 %v2758_v11 }
 0x2ae   : > { %813 = vmatpush.msrb.mxu2 %v748_v21  ;;  %862 = vmatpush.msrb.mxu3 %v2763_v22 }
 0x2af   : > { %1881 = vmatmul.msk.f32.vlgmr.msrb.gmra.mxu2 %vm405_vm1, %v2430_v44  ;;  %1889 = vmatmul.msk.f32.vlgmr.msrb.gmra.mxu3 %vm405_vm1, %v2430_v44 }
 0x2b7   : > { %1882 = vmatmul.msk.f32.gmra.mxu2 %vm405_vm1, %v2441_v47  ;;  %1890 = vmatmul.msk.f32.gmra.mxu3 %vm405_vm1, %v2441_v47 }
 0x2bf   : > { %1883 = vmatmul.msk.f32.gmra.mxu2 %vm405_vm1, %v2450_v53  ;;  %1891 = vmatmul.msk.f32.gmra.mxu3 %vm405_vm1, %v2450_v53 }
 0x2c7   : > { %1884 = vmatmul.msk.f32.gmra.mxu2 %vm405_vm1, %v2459_v54  ;;  %1892 = vmatmul.msk.f32.gmra.mxu3 %vm405_vm1, %v2459_v54 }
 0x2cf   : > { %1885 = vmatmul.msk.f32.gmra.mxu2 %vm405_vm1, %v2468_v55  ;;  %1893 = vmatmul.msk.f32.gmra.mxu3 %vm405_vm1, %v2468_v55 }
 0x2d7   : > { %1886 = vmatmul.msk.f32.gmra.mxu2 %vm405_vm1, %v2477_v56  ;;  %1894 = vmatmul.msk.f32.gmra.mxu3 %vm405_vm1, %v2477_v56 }
 0x2df   : > { %1887 = vmatmul.msk.f32.gmra.mxu2 %vm405_vm1, %v2486_v57  ;;  %1895 = vmatmul.msk.f32.gmra.mxu3 %vm405_vm1, %v2486_v57 }
 0x2e7   : > { %1888 = vmatmul.msk.f32.gmra.mxu2 %vm405_vm1, %v3611_v30  ;;  %1896 = vmatmul.msk.f32.gmra.mxu3 %vm405_vm1, %v3611_v30 }
 0x332   : > { %v815_v49 = vpop.f32.mrf.mxu2  ;;  %v864_v4 = vpop.f32.mrf.mxu3 }
 0x333   : > { %v839_v10 = vsub.f32 %v815_v49, %v3618_v8  ;;  %v888_v39 = vsub.f32 %v864_v4, %v3620_v12  ;;  %v2806_v49 = vstv %s913_s28  ;;  %s1744_s28 = scalar_lea.hbm %s3559_s4, %s1971_s23 }
 0x335   : > { %v897_v45 = vmul.f32 %v896_v1, %v839_v10  ;;  %v940_v4 = vmul.f32 %v896_v1, %v888_v39 }
 0x337   : > { %v2812_v10 = vsub.f32 %v748_v21, %v897_v45 }
 0x33a   : > { %v818_v63 = vpop.f32.mrf.mxu2  ;;  %v867_v32 = vpop.f32.mrf.mxu3 }
 0x33b   : > { %v840_v45 = vsub.f32 %v818_v63, %v2315_v18  ;;  %v889_v39 = vsub.f32 %v867_v32, %v2317_v19 }
 0x342   : > { %v821_v15 = vpop.f32.mrf.mxu2  ;;  %v870_v41 = vpop.f32.mrf.mxu3 }
 0x34a   : > { %v824_v13 = vpop.f32.mrf.mxu2  ;;  %v873_v38 = vpop.f32.mrf.mxu3 }
 0x352   : > { %v827_v40 = vpop.f32.mrf.mxu2  ;;  %v876_v31 = vpop.f32.mrf.mxu3 }
 0x353   : > { %v843_v37 = vsub.f32 %v827_v40, %v3621_v28  ;;  %v892_v2 = vsub.f32 %v876_v31, %v3622_v50  ;;  %v3624_v40 = vld [vmem:[#allocation13_spill] sm:$0xff] }
 0x354   : > { %v890_v28 = vsub.f32 %v870_v41, %v3624_v40 }
 0x355   : > { %v901_v31 = vmul.f32 %v896_v1, %v843_v37 }
 0x35a   : > { %v830_v5 = vpop.f32.mrf.mxu2  ;;  %v879_v6 = vpop.f32.mrf.mxu3 }
 0x35b   : > { %v844_v43 = vsub.f32 %v830_v5, %v2331_v26  ;;  %v893_v34 = vsub.f32 %v879_v6, %v2333_v27  ;;  %v841_v6 = vsub.f32 %v821_v15, %v2319_v20 }
 0x35d   : > { %v902_v5 = vmul.f32 %v896_v1, %v844_v43  ;;  %v945_v26 = vmul.f32 %v896_v1, %v893_v34  ;;  %v899_v40 = vmul.f32 %v896_v1, %v841_v6 }
 0x35f   : > { %v910_v41 = vsub.f32 %v2722_v59, %v902_v5  ;;  %v953_v34 = vsub.f32 %v2724_v46, %v945_v26  ;;  %v941_v59 = vmul.f32 %v896_v1, %v889_v39  ;;  %v907_v5 = vsub.f32 %v2749_v25, %v899_v40 }
 0x360   : > { %v948_v39 = vsub.f32 %v2763_v22, %v940_v4 }
 0x362   : > { %v833_v9 = vpop.f32.mrf.mxu2  ;;  %v882_v48 = vpop.f32.mrf.mxu3 }
 0x363   : > { %v845_v60 = vsub.f32 %v833_v9, %v3619_v58  ;;  %v894_v16 = vsub.f32 %v882_v48, %v2337_v29  ;;  %v842_v9 = vsub.f32 %v824_v13, %v3615_v0  ;;  %v3623_v58 = vld [vmem:[#allocation15_spill] sm:$0xff]  ;;  %v2810_v29 = vstv %s797_s26 }
 0x364   : > { %v891_v48 = vsub.f32 %v873_v38, %v3623_v58 }
 0x365   : > { %v903_v23 = vmul.f32 %v896_v1, %v845_v60  ;;  %v946_v33 = vmul.f32 %v896_v1, %v894_v16  ;;  %v944_v60 = vmul.f32 %v896_v1, %v892_v2  ;;  %v900_v43 = vmul.f32 %v896_v1, %v842_v9 }
 0x366   : > { %v943_v15 = vmul.f32 %v896_v1, %v891_v48  ;;  %v898_v9 = vmul.f32 %v896_v1, %v840_v45 }
 0x367   : > { %v911_v27 = vsub.f32 %v2712_v14, %v903_v23  ;;  %v954_v13 = vsub.f32 %v2714_v17, %v946_v33  ;;  %v942_v14 = vmul.f32 %v896_v1, %v890_v28  ;;  %v909_v17 = vsub.f32 %v2733_v42, %v901_v31 }
 0x368   : > { %v952_v23 = vsub.f32 %v2735_v7, %v944_v60  ;;  %v908_v26 = vsub.f32 %v2741_v24, %v900_v43  ;;  %v951_v46 = vsub.f32 %v2743_v62, %v943_v15  ;;  %v920_v28 = vmax.f32 %v2806_v49, %v910_v41 }
 0x369   : > { %v962_v63 = vmax.f32 %v2806_v49, %v954_v13  ;;  %v961_v42 = vmax.f32 %v2806_v49, %v953_v34  ;;  %v906_v60 = vsub.f32 %v2756_v52, %v898_v9  ;;  %v917_v43 = vmax.f32 %v2806_v49, %v907_v5 }
 0x36a   : > { %v836_v16 = vpop.f32.mrf.mxu2  ;;  %v885_v50 = vpop.f32.mrf.mxu3  ;;  %v918_v25 = vmax.f32 %v2806_v49, %v908_v26 }
 0x36b   : > { %v846_v38 = vsub.f32 %v836_v16, %v2343_v35  ;;  %v895_v21 = vsub.f32 %v885_v50, %v2345_v36  ;;  %v921_v50 = vmax.f32 %v2806_v49, %v911_v27  ;;  %v970_v31 = vmin.f32 %v2810_v29, %v962_v63 }
 0x36c   : > { %v949_v16 = vsub.f32 %v2758_v11, %v941_v59  ;;  %v969_v45 = vmin.f32 %v2810_v29, %v961_v42  ;;  %v927_v4 = vmin.f32 %v2810_v29, %v918_v25  ;;  %v3626_v25 = vld [vmem:[#allocation21_spill] sm:$0xff] }
 0x36d   : > { %v904_v37 = vmul.f32 %v896_v1, %v846_v38  ;;  %v947_v2 = vmul.f32 %v896_v1, %v895_v21  ;;  %v960_v1 = vmax.f32 %v2806_v49, %v952_v23  ;;  %v930_v6 = vmin.f32 %v2810_v29, %v921_v50 }
 0x36e   : > { %v929_v21 = vmin.f32 %v2810_v29, %v920_v28  ;;  %v957_v22 = vmax.f32 %v2806_v49, %v949_v16  ;;  %v2872_v63 = vsub.f32 %v953_v34, %v969_v45  ;;  %v2889_v28 = vsub.f32 %v908_v26, %v927_v4 }
 0x36f   : > { %v912_v32 = vsub.f32 %v2700_v61, %v904_v37  ;;  %v955_v33 = vsub.f32 %v2702_v3, %v947_v2  ;;  %v950_v61 = vsub.f32 %v2751_v51, %v942_v14  ;;  %v919_v3 = vmax.f32 %v2806_v49, %v909_v17 }
 0x370   : > { %v959_v51 = vmax.f32 %v2806_v49, %v951_v46  ;;  %v2860_v15 = vsub.f32 %v911_v27, %v930_v6  ;;  %v2862_v37 = vsub.f32 %v954_v13, %v970_v31  ;;  %v968_v2 = vmin.f32 %v2810_v29, %v960_v1 }
 0x371   : > { %v922_v7 = vmax.f32 %v2806_v49, %v912_v32  ;;  %v963_v48 = vmax.f32 %v2806_v49, %v955_v33  ;;  %v958_v52 = vmax.f32 %v2806_v49, %v950_v61  ;;  %v928_v11 = vmin.f32 %v2810_v29, %v919_v3 }
 0x372   : > { %v916_v14 = vmax.f32 %v2806_v49, %v906_v60  ;;  %v2870_v50 = vsub.f32 %v910_v41, %v929_v21  ;;  %v967_v27 = vmin.f32 %v2810_v29, %v959_v51  ;;  %v915_v13 = vmax.f32 %v2806_v49, %v2812_v10 }
 0x373   : > { %v931_v24 = vmin.f32 %v2810_v29, %v922_v7  ;;  %v971_v62 = vmin.f32 %v2810_v29, %v963_v48  ;;  %v2881_v9 = vsub.f32 %v909_v17, %v928_v11  ;;  %v2883_v59 = vsub.f32 %v952_v23, %v968_v2  ;;  %v3629_v2 = vld [vmem:[#allocation16_spill] sm:$0xff] }
 0x374   : > { %v966_v41 = vmin.f32 %v2810_v29, %v958_v52  ;;  %v925_v34 = vmin.f32 %v2810_v29, %v916_v14  ;;  %v965_v42 = vmin.f32 %v2810_v29, %v957_v22  ;;  %v924_v7 = vmin.f32 %v2810_v29, %v915_v13  ;;  %v3628_v52 = vld [vmem:[#allocation19_spill] sm:$0xff]  ;;  %v3630_v22 = vld [vmem:[#allocation17_spill] sm:$0xff] }
 0x375   : > { %v2848_v40 = vsub.f32 %v912_v32, %v931_v24  ;;  %v2850_v38 = vsub.f32 %v955_v33, %v971_v62  ;;  %v956_v32 = vmax.f32 %v2806_v49, %v948_v39  ;;  %v926_v33 = vmin.f32 %v2810_v29, %v917_v43 }
 0x376   : > { %v2891_v49 = vsub.f32 %v951_v46, %v967_v27  ;;  %v2899_v23 = vsub.f32 %v950_v61, %v966_v41  ;;  %v2904_v26 = vsub.f32 %v906_v60, %v925_v34  ;;  %v2906_v46 = vsub.f32 %v949_v16, %v965_v42 }
 0x377   : > { %990 = vmatpush.msra.mxu0 %v2848_v40  ;;  %1039 = vmatpush.msra.mxu1 %v2850_v38  ;;  %v2897_v17 = vsub.f32 %v907_v5, %v926_v33  ;;  %v964_v48 = vmin.f32 %v2810_v29, %v956_v32  ;;  %v932_v3 = vsub.f32 %v2812_v10, %v924_v7  ;;  %v1080_v6 = vstv %s1897_s7  ;;  %s1747_s7 = sshll.u32 %s1744_s28, 4  ;;  %s1748_s7 = int_to_ptr.hbm [resolvable:$true] %s1747_s7 }
 0x378   : > { %v2954_v32 = vstv %s1097_s8  ;;  %v2958_v34 = vstv %s981_s6  ;;  %s1914_s8 = sld [smem:[#allocation3 + $0x5]]  ;;  %s1733_s6 = scalar_lea.sflag [#allocation6], %s2263_s10 }
 0x379   : > { %991 = vmatpush.msra.mxu0 %v2860_v15  ;;  %1040 = vmatpush.msra.mxu1 %v2862_v37  ;;  %v2911_v5 = vsub.f32 %v948_v39, %v964_v48  ;;  %v3627_v39 = vld [vmem:[#allocation18_spill] sm:$0xff] }
 0x37b   : > { %992 = vmatpush.msra.mxu0 %v2870_v50  ;;  %1041 = vmatpush.msra.mxu1 %v2872_v63 }
 0x37d   : > { %993 = vmatpush.msra.mxu0 %v2881_v9  ;;  %1042 = vmatpush.msra.mxu1 %v2883_v59 }
 0x37e   : > { %s1165_s9 = smul.f32 0.1, %s1914_s8 }
 0x37f   : > { %994 = vmatpush.msra.mxu0 %v2889_v28  ;;  %1043 = vmatpush.msra.mxu1 %v2891_v49 }
 0x380   : > { %s1281_s11 = ssub.f32 0.0, %s1165_s9 }
 0x381   : > { %995 = vmatpush.msra.mxu0 %v2897_v17  ;;  %1044 = vmatpush.msra.mxu1 %v2899_v23 }
 0x383   : > { %996 = vmatpush.msra.mxu0 %v2904_v26  ;;  %1045 = vmatpush.msra.mxu1 %v2906_v46 }
 0x385   : > { %997 = vmatpush.msra.mxu0 %v932_v3  ;;  %1046 = vmatpush.msra.mxu1 %v2911_v5 }
 0x386   : > { %1898 = vmatmul.msk.f32.vlgmr.msra.gmra.mxu0 %vm405_vm1, %v2430_v44  ;;  %1906 = vmatmul.msk.f32.vlgmr.msra.gmra.mxu1 %vm405_vm1, %v2430_v44 }
 0x38e   : > { %1899 = vmatmul.msk.f32.gmra.mxu0 %vm405_vm1, %v2441_v47  ;;  %1907 = vmatmul.msk.f32.gmra.mxu1 %vm405_vm1, %v2441_v47 }
 0x396   : > { %1900 = vmatmul.msk.f32.gmra.mxu0 %vm405_vm1, %v2450_v53  ;;  %1908 = vmatmul.msk.f32.gmra.mxu1 %vm405_vm1, %v2450_v53 }
 0x39e   : > { %1901 = vmatmul.msk.f32.gmra.mxu0 %vm405_vm1, %v2459_v54  ;;  %1909 = vmatmul.msk.f32.gmra.mxu1 %vm405_vm1, %v2459_v54 }
 0x3a6   : > { %1902 = vmatmul.msk.f32.gmra.mxu0 %vm405_vm1, %v2468_v55  ;;  %1910 = vmatmul.msk.f32.gmra.mxu1 %vm405_vm1, %v2468_v55 }
 0x3ae   : > { %1903 = vmatmul.msk.f32.gmra.mxu0 %vm405_vm1, %v2477_v56  ;;  %1911 = vmatmul.msk.f32.gmra.mxu1 %vm405_vm1, %v2477_v56 }
 0x3b6   : > { %1904 = vmatmul.msk.f32.gmra.mxu0 %vm405_vm1, %v2486_v57  ;;  %1912 = vmatmul.msk.f32.gmra.mxu1 %vm405_vm1, %v2486_v57 }
 0x3be   : > { %1905 = vmatmul.msk.f32.gmra.mxu0 %vm405_vm1, %v3611_v30  ;;  %1913 = vmatmul.msk.f32.gmra.mxu1 %vm405_vm1, %v3611_v30  ;;  %v3625_v30 = vld [vmem:[#allocation20_spill] sm:$0xff] }
 0x403   : > { %v999_v29 = vpop.f32.mrf.mxu0  ;;  %v1048_v44 = vpop.f32.mrf.mxu1 }
 0x404   : > { %v1023_v57 = vsub.f32 %v999_v29, %v3618_v8  ;;  %v1072_v45 = vsub.f32 %v1048_v44, %v3620_v12 }
 0x406   : > { %v1081_v21 = vmul.f32 %v1080_v6, %v1023_v57  ;;  %v1124_v7 = vmul.f32 %v1080_v6, %v1072_v45 }
 0x408   : > { %v2960_v42 = vsub.f32 %v932_v3, %v1081_v21 }
 0x40b   : > { %v1002_v47 = vpop.f32.mrf.mxu0  ;;  %v1051_v53 = vpop.f32.mrf.mxu1 }
 0x413   : > { %v1005_v54 = vpop.f32.mrf.mxu0  ;;  %v1054_v55 = vpop.f32.mrf.mxu1 }
 0x414   : > { %v1025_v44 = vsub.f32 %v1005_v54, %v2319_v20 }
 0x41b   : > { %v1008_v10 = vpop.f32.mrf.mxu0  ;;  %v1057_v56 = vpop.f32.mrf.mxu1 }
 0x41c   : > { %v1026_v33 = vsub.f32 %v1008_v10, %v3615_v0  ;;  %v1075_v41 = vsub.f32 %v1057_v56, %v3623_v58 }
 0x41e   : > { %v1084_v21 = vmul.f32 %v1080_v6, %v1026_v33  ;;  %v1127_v54 = vmul.f32 %v1080_v6, %v1075_v41 }
 0x420   : > { %v1135_v41 = vsub.f32 %v2891_v49, %v1127_v54 }
 0x423   : > { %v1011_v61 = vpop.f32.mrf.mxu0  ;;  %v1060_v1 = vpop.f32.mrf.mxu1 }
 0x424   : > { %v1027_v14 = vsub.f32 %v1011_v61, %v3629_v2  ;;  %v1076_v4 = vsub.f32 %v1060_v1, %v3630_v22  ;;  %v3631_v61 = vld [vmem:[#allocation13_spill] sm:$0xff] }
 0x426   : > { %v1085_v1 = vmul.f32 %v1080_v6, %v1027_v14  ;;  %v1083_v14 = vmul.f32 %v1080_v6, %v1025_v44 }
 0x428   : > { %v1091_v44 = vsub.f32 %v2897_v17, %v1083_v14 }
 0x42b   : > { %v1014_v24 = vpop.f32.mrf.mxu0  ;;  %v1063_v62 = vpop.f32.mrf.mxu1 }
 0x42c   : > { %v1028_v43 = vsub.f32 %v1014_v24, %v3627_v39  ;;  %v1077_v11 = vsub.f32 %v1063_v62, %v3628_v52  ;;  %v1074_v24 = vsub.f32 %v1054_v55, %v3631_v61  ;;  %v1128_v62 = vmul.f32 %v1080_v6, %v1076_v4 }
 0x42e   : > { %v1086_v48 = vmul.f32 %v1080_v6, %v1028_v43  ;;  %v1129_v29 = vmul.f32 %v1080_v6, %v1077_v11  ;;  %v1136_v4 = vsub.f32 %v2883_v59, %v1128_v62 }
 0x430   : > { %v1094_v55 = vsub.f32 %v2870_v50, %v1086_v48  ;;  %v1137_v45 = vsub.f32 %v2872_v63, %v1129_v29  ;;  %v1092_v63 = vsub.f32 %v2889_v28, %v1084_v21  ;;  %v1101_v21 = vmax.f32 %v2954_v32, %v1091_v44 }
 0x432   : > { %v1104_v48 = vmax.f32 %v2954_v32, %v1094_v55  ;;  %v1102_v17 = vmax.f32 %v2954_v32, %v1092_v63 }
 0x433   : > { %v1017_v31 = vpop.f32.mrf.mxu0  ;;  %v1066_v60 = vpop.f32.mrf.mxu1 }
 0x434   : > { %v1029_v16 = vsub.f32 %v1017_v31, %v3625_v30  ;;  %v1078_v51 = vsub.f32 %v1066_v60, %v3626_v25 }
 0x436   : > { %v1087_v27 = vmul.f32 %v1080_v6, %v1029_v16  ;;  %v1130_v13 = vmul.f32 %v1080_v6, %v1078_v51  ;;  %v1024_v16 = vsub.f32 %v1002_v47, %v2315_v18  ;;  %v1073_v51 = vsub.f32 %v1051_v53, %v2317_v19 }
 0x438   : > { %v1095_v60 = vsub.f32 %v2860_v15, %v1087_v27  ;;  %v1138_v10 = vsub.f32 %v2862_v37, %v1130_v13  ;;  %v1126_v15 = vmul.f32 %v1080_v6, %v1074_v24  ;;  %v1093_v37 = vsub.f32 %v2881_v9, %v1085_v1 }
 0x439   : > { %v1082_v33 = vmul.f32 %v1080_v6, %v1024_v16  ;;  %v1125_v50 = vmul.f32 %v1080_v6, %v1073_v51  ;;  %v1145_v9 = vmax.f32 %v2954_v32, %v1137_v45  ;;  %v1132_v51 = vsub.f32 %v2911_v5, %v1124_v7 }
 0x43a   : > { %v1105_v27 = vmax.f32 %v2954_v32, %v1095_v60  ;;  %v1146_v47 = vmax.f32 %v2954_v32, %v1138_v10  ;;  %v1111_v7 = vmin.f32 %v2958_v34, %v1102_v17 }
 0x43b   : > { %v1020_v57 = vpop.f32.mrf.mxu0  ;;  %v1069_v31 = vpop.f32.mrf.mxu1  ;;  %v1090_v62 = vsub.f32 %v2904_v26, %v1082_v33  ;;  %v1153_v16 = vmin.f32 %v2958_v34, %v1145_v9 }
 0x43c   : > { %v1030_v56 = vsub.f32 %v1020_v57, %v2343_v35  ;;  %v1079_v3 = vsub.f32 %v1069_v31, %v2345_v36  ;;  %v1114_v24 = vmin.f32 %v2958_v34, %v1105_v27  ;;  %v1154_v1 = vmin.f32 %v2958_v34, %v1146_v47 }
 0x43d   : > { %v1133_v57 = vsub.f32 %v2906_v46, %v1125_v50  ;;  %v1100_v14 = vmax.f32 %v2954_v32, %v1090_v62  ;;  %v3020_v27 = vsub.f32 %v1137_v45, %v1153_v16  ;;  %v1140_v47 = vmax.f32 %v2954_v32, %v1132_v51 }
 0x43e   : > { %v1088_v43 = vmul.f32 %v1080_v6, %v1030_v56  ;;  %v1131_v11 = vmul.f32 %v1080_v6, %v1079_v3  ;;  %v1144_v6 = vmax.f32 %v2954_v32, %v1136_v4  ;;  %v1113_v3 = vmin.f32 %v2958_v34, %v1104_v48 }
 0x43f   : > { %v3008_v54 = vsub.f32 %v1095_v60, %v1114_v24  ;;  %v1141_v5 = vmax.f32 %v2954_v32, %v1133_v57  ;;  %v1109_v45 = vmin.f32 %v2958_v34, %v1100_v14  ;;  %v3037_v50 = vsub.f32 %v1092_v63, %v1111_v7  ;;  %v3128_v24 = vld [vmem:[%s3556_s1 + $0x38] sm:$0xff] }
 0x440   : > { %v1096_v53 = vsub.f32 %v2848_v40, %v1088_v43  ;;  %v1139_v13 = vsub.f32 %v2850_v38, %v1131_v11  ;;  %v1134_v40 = vsub.f32 %v2899_v23, %v1126_v15  ;;  %v1103_v38 = vmax.f32 %v2954_v32, %v1093_v37  ;;  %3632 = vst [vmem:[#allocation22_spill] sm:$0xff] %v3128_v24 }
 0x441   : > { %v1143_v23 = vmax.f32 %v2954_v32, %v1135_v41  ;;  %v3010_v43 = vsub.f32 %v1138_v10, %v1154_v1  ;;  %v1152_v11 = vmin.f32 %v2958_v34, %v1144_v6  ;;  %v3018_v15 = vsub.f32 %v1094_v55, %v1113_v3  ;;  %v3101_v6 = vld [vmem:[%s3556_s1 + $0x20] sm:$0xff] }
 0x442   : > { %v1106_v59 = vmax.f32 %v2954_v32, %v1096_v53  ;;  %v1147_v29 = vmax.f32 %v2954_v32, %v1139_v13  ;;  %v1142_v26 = vmax.f32 %v2954_v32, %v1134_v40  ;;  %v1112_v46 = vmin.f32 %v2958_v34, %v1103_v38  ;;  %v3092_v38 = vld [vmem:[%s3556_s1 + $0x18] sm:$0xff] }
 0x443   : > { %v1151_v60 = vmin.f32 %v2958_v34, %v1143_v23  ;;  %v1099_v10 = vmax.f32 %v2954_v32, %v2960_v42  ;;  %v3031_v33 = vsub.f32 %v1136_v4, %v1152_v11  ;;  %v1149_v48 = vmin.f32 %v2958_v34, %v1141_v5 }
 0x444   : > { %v1115_v28 = vmin.f32 %v2958_v34, %v1106_v59  ;;  %v1155_v49 = vmin.f32 %v2958_v34, %v1147_v29  ;;  %v1150_v55 = vmin.f32 %v2958_v34, %v1142_v26  ;;  %v1148_v59 = vmin.f32 %v2958_v34, %v1140_v47 }
 0x445   : > { %v3039_v32 = vsub.f32 %v1135_v41, %v1151_v60  ;;  %v1108_v9 = vmin.f32 %v2958_v34, %v1099_v10  ;;  %v3052_v63 = vsub.f32 %v1090_v62, %v1109_v45  ;;  %v3054_v41 = vsub.f32 %v1133_v57, %v1149_v48 }
 0x446   : > { %v2996_v31 = vsub.f32 %v1096_v53, %v1115_v28  ;;  %v2998_v56 = vsub.f32 %v1139_v13, %v1155_v49  ;;  %v1110_v53 = vmin.f32 %v2958_v34, %v1101_v21  ;;  %v3029_v13 = vsub.f32 %v1093_v37, %v1112_v46  ;;  %v3065_v34 = vld [vmem:[%s3556_s1] sm:$0xff]  ;;  %v3110_v28 = vld [vmem:[%s3556_s1 + $0x28] sm:$0xff]  ;;  %v3119_v49 = vld [vmem:[%s3556_s1 + $0x30] sm:$0xff] }
 0x447   : > { %v3047_v4 = vsub.f32 %v1134_v40, %v1150_v55  ;;  %v1116_v29 = vsub.f32 %v2960_v42, %v1108_v9  ;;  %v3074_v42 = vld [vmem:[%s3556_s1 + $0x8] sm:$0xff]  ;;  %v3083_v40 = vld [vmem:[%s3556_s1 + $0x10] sm:$0xff]  ;;  %v1264_v5 = vstv %s1914_s8  ;;  %s2089_s8 = sshra.s32 %s1748_s7, 4  ;;  %s2090_s8 = int_to_ptr.hbm [resolvable:$true] %s2089_s8 }
 0x448   : > { %1174 = vmatpush.msra.mxu2 %v2996_v31  ;;  %1223 = vmatpush.msra.mxu3 %v2998_v56  ;;  %v3045_v37 = vsub.f32 %v1091_v44, %v1110_v53  ;;  %v3059_v44 = vsub.f32 %v1132_v51, %v1148_v59  ;;  %p2096_p1 = scmp.lt.s32.totalorder %s2090_s8, %s3559_s4 }
 0x44a   : > { %1175 = vmatpush.msra.mxu2 %v3008_v54  ;;  %1224 = vmatpush.msra.mxu3 %v3010_v43 }
 0x44c   : > { %1176 = vmatpush.msra.mxu2 %v3018_v15  ;;  %1225 = vmatpush.msra.mxu3 %v3020_v27 }
 0x44e   : > { %1177 = vmatpush.msra.mxu2 %v3029_v13  ;;  %1226 = vmatpush.msra.mxu3 %v3031_v33 }
 0x450   : > { %1178 = vmatpush.msra.mxu2 %v3037_v50  ;;  %1227 = vmatpush.msra.mxu3 %v3039_v32 }
 0x452   : > { %1179 = vmatpush.msra.mxu2 %v3045_v37  ;;  %1228 = vmatpush.msra.mxu3 %v3047_v4 }
 0x454   : > { %1180 = vmatpush.msra.mxu2 %v3052_v63  ;;  %1229 = vmatpush.msra.mxu3 %v3054_v41 }
 0x456   : > { %1181 = vmatpush.msra.mxu2 %v1116_v29  ;;  %1230 = vmatpush.msra.mxu3 %v3059_v44 }
 0x457   : > { %1915 = vmatmul.msk.f32.vlgmr.msra.gmra.mxu2 %vm405_vm1, %v3065_v34  ;;  %1923 = vmatmul.msk.f32.vlgmr.msra.gmra.mxu3 %vm405_vm1, %v3065_v34 }
 0x45f   : > { %1916 = vmatmul.msk.f32.gmra.mxu2 %vm405_vm1, %v3074_v42  ;;  %1924 = vmatmul.msk.f32.gmra.mxu3 %vm405_vm1, %v3074_v42 }
 0x467   : > { %1917 = vmatmul.msk.f32.gmra.mxu2 %vm405_vm1, %v3083_v40  ;;  %1925 = vmatmul.msk.f32.gmra.mxu3 %vm405_vm1, %v3083_v40 }
 0x46f   : > { %1918 = vmatmul.msk.f32.gmra.mxu2 %vm405_vm1, %v3092_v38  ;;  %1926 = vmatmul.msk.f32.gmra.mxu3 %vm405_vm1, %v3092_v38 }
 0x477   : > { %1919 = vmatmul.msk.f32.gmra.mxu2 %vm405_vm1, %v3101_v6  ;;  %1927 = vmatmul.msk.f32.gmra.mxu3 %vm405_vm1, %v3101_v6 }
 0x47f   : > { %1920 = vmatmul.msk.f32.gmra.mxu2 %vm405_vm1, %v3110_v28  ;;  %1928 = vmatmul.msk.f32.gmra.mxu3 %vm405_vm1, %v3110_v28 }
 0x487   : > { %1921 = vmatmul.msk.f32.gmra.mxu2 %vm405_vm1, %v3119_v49  ;;  %1929 = vmatmul.msk.f32.gmra.mxu3 %vm405_vm1, %v3119_v49 }
 0x48f   : > { %1922 = vmatmul.msk.f32.gmra.mxu2 %vm405_vm1, %v3128_v24  ;;  %1930 = vmatmul.msk.f32.gmra.mxu3 %vm405_vm1, %v3128_v24  ;;  %v3142_v24 = vstv %s1281_s11 }
 0x4da   : > { %v1183_v1 = vpop.f32.mrf.mxu2  ;;  %v1232_v62 = vpop.f32.mrf.mxu3 }
 0x4db   : > { %v1207_v14 = vsub.f32 %v1183_v1, %v3618_v8  ;;  %v1256_v55 = vsub.f32 %v1232_v62, %v3620_v12 }
 0x4dd   : > { %v1265_v53 = vmul.f32 %v1264_v5, %v1207_v14  ;;  %v1308_v62 = vmul.f32 %v1264_v5, %v1256_v55 }
 0x4df   : > { %v3148_v14 = vsub.f32 %v1116_v29, %v1265_v53 }
 0x4e2   : > { %v1186_v57 = vpop.f32.mrf.mxu2  ;;  %v1235_v17 = vpop.f32.mrf.mxu3 }
 0x4e3   : > { %v1208_v53 = vsub.f32 %v1186_v57, %v2315_v18  ;;  %v1257_v55 = vsub.f32 %v1235_v17, %v2317_v19 }
 0x4ea   : > { %v1189_v23 = vpop.f32.mrf.mxu2  ;;  %v1238_v3 = vpop.f32.mrf.mxu3 }
 0x4f2   : > { %v1192_v16 = vpop.f32.mrf.mxu2  ;;  %v1241_v51 = vpop.f32.mrf.mxu3 }
 0x4fa   : > { %v1195_v21 = vpop.f32.mrf.mxu2  ;;  %v1244_v26 = vpop.f32.mrf.mxu3 }
 0x4fb   : > { %v1211_v9 = vsub.f32 %v1195_v21, %v3629_v2  ;;  %v1260_v59 = vsub.f32 %v1244_v26, %v3630_v22  ;;  %v1258_v21 = vsub.f32 %v1238_v3, %v3631_v61 }
 0x4fd   : > { %v1269_v26 = vmul.f32 %v1264_v5, %v1211_v9 }
 0x502   : > { %v1198_v46 = vpop.f32.mrf.mxu2  ;;  %v1247_v11 = vpop.f32.mrf.mxu3 }
 0x503   : > { %v1212_v45 = vsub.f32 %v1198_v46, %v3627_v39  ;;  %v1261_v48 = vsub.f32 %v1247_v11, %v3628_v52  ;;  %v1209_v11 = vsub.f32 %v1189_v23, %v2319_v20 }
 0x505   : > { %v1270_v46 = vmul.f32 %v1264_v5, %v1212_v45  ;;  %v1313_v39 = vmul.f32 %v1264_v5, %v1261_v48  ;;  %v1267_v61 = vmul.f32 %v1264_v5, %v1209_v11 }
 0x507   : > { %v1278_v3 = vsub.f32 %v3018_v15, %v1270_v46  ;;  %v1321_v48 = vsub.f32 %v3020_v27, %v1313_v39  ;;  %v1309_v15 = vmul.f32 %v1264_v5, %v1257_v55  ;;  %v1275_v11 = vsub.f32 %v3045_v37, %v1267_v61 }
 0x508   : > { %v1316_v55 = vsub.f32 %v3059_v44, %v1308_v62 }
 0x50a   : > { %v1201_v7 = vpop.f32.mrf.mxu2  ;;  %v1250_v60 = vpop.f32.mrf.mxu3 }
 0x50b   : > { %v1213_v10 = vsub.f32 %v1201_v7, %v3625_v30  ;;  %v1262_v47 = vsub.f32 %v1250_v60, %v3626_v25  ;;  %v1210_v7 = vsub.f32 %v1192_v16, %v3615_v0  ;;  %v1259_v60 = vsub.f32 %v1241_v51, %v3623_v58 }
 0x50c   : > { %v3146_v25 = vstv %s1165_s9  ;;  %s2091_s9 = scalar_lea.hbm %s2090_s8, 128 }
 0x50d   : > { %v1271_v1 = vmul.f32 %v1264_v5, %v1213_v10  ;;  %v1314_v8 = vmul.f32 %v1264_v5, %v1262_v47  ;;  %v1312_v10 = vmul.f32 %v1264_v5, %v1260_v59  ;;  %v1268_v45 = vmul.f32 %v1264_v5, %v1210_v7  ;;  %p2092_p6 = scmp.ne.s32.totalorder %s2090_s8, %s2091_s9 }
 0x50e   : > { %v1311_v23 = vmul.f32 %v1264_v5, %v1259_v60  ;;  %v1266_v7 = vmul.f32 %v1264_v5, %v1208_v53  ;;  %v1288_v60 = vmax.f32 %v3142_v24, %v1278_v3 }
 0x50f   : > { %v1279_v2 = vsub.f32 %v3008_v54, %v1271_v1  ;;  %v1322_v16 = vsub.f32 %v3010_v43, %v1314_v8  ;;  %v1310_v54 = vmul.f32 %v1264_v5, %v1258_v21  ;;  %v1277_v8 = vsub.f32 %v3029_v13, %v1269_v26  ;;  %p2093_p12 = pnand %p2092_p6, %p2229_p10 }
 0x510   : > { %v1320_v43 = vsub.f32 %v3031_v33, %v1312_v10  ;;  %v1276_v39 = vsub.f32 %v3037_v50, %v1268_v45  ;;  %v1319_v27 = vsub.f32 %v3039_v32, %v1311_v23  ;;  %v1329_v13 = vmax.f32 %v3142_v24, %v1321_v48 }
 0x511   : > { %v1330_v57 = vmax.f32 %v3142_v24, %v1322_v16  ;;  %v1274_v10 = vsub.f32 %v3052_v63, %v1266_v7  ;;  %v1285_v45 = vmax.f32 %v3142_v24, %v1275_v11  ;;  %p2094_p13 = pneg %p2093_p12 }
 0x512   : > { %v1204_v47 = vpop.f32.mrf.mxu2  ;;  %v1253_v22 = vpop.f32.mrf.mxu3  ;;  %v1286_v61 = vmax.f32 %v3142_v24, %v1276_v39  ;;  %v1327_v37 = vmax.f32 %v3142_v24, %v1319_v27  ;;  %v1337_v53 = vmin.f32 %v3146_v25, %v1329_v13 }
 0x513   : > { %v1214_v51 = vsub.f32 %v1204_v47, %v2343_v35  ;;  %v1263_v29 = vsub.f32 %v1253_v22, %v2345_v36  ;;  %v1289_v22 = vmax.f32 %v3142_v24, %v1279_v2  ;;  %v1338_v26 = vmin.f32 %v3146_v25, %v1330_v57 }
 0x514   : > { %v1317_v47 = vsub.f32 %v3054_v41, %v1309_v15  ;;  %v1295_v62 = vmin.f32 %v3146_v25, %v1286_v61  ;;  %v3208_v57 = vsub.f32 %v1321_v48, %v1337_v53  ;;  %v3634_v53 = vld [vmem:[#allocation11_spill] sm:$0xff] }
 0x515   : > { %v1272_v9 = vmul.f32 %v1264_v5, %v1214_v51  ;;  %v1315_v59 = vmul.f32 %v1264_v5, %v1263_v29  ;;  %v1328_v5 = vmax.f32 %v3142_v24, %v1320_v43  ;;  %v1298_v21 = vmin.f32 %v3146_v25, %v1289_v22 }
 0x516   : > { %v1297_v29 = vmin.f32 %v3146_v25, %v1288_v60  ;;  %v1325_v44 = vmax.f32 %v3142_v24, %v1317_v47  ;;  %v3225_v60 = vsub.f32 %v1276_v39, %v1295_v62 }
 0x517   : > { %v1280_v17 = vsub.f32 %v2996_v31, %v1272_v9  ;;  %v1323_v1 = vsub.f32 %v2998_v56, %v1315_v59  ;;  %v1318_v31 = vsub.f32 %v3047_v4, %v1310_v54  ;;  %v1287_v56 = vmax.f32 %v3142_v24, %v1277_v8 }
 0x518   : > { %v3196_v23 = vsub.f32 %v1279_v2, %v1298_v21  ;;  %v3198_v9 = vsub.f32 %v1322_v16, %v1338_v26  ;;  %v1336_v59 = vmin.f32 %v3146_v25, %v1328_v5  ;;  %v1284_v54 = vmax.f32 %v3142_v24, %v1274_v10 }
 0x519   : > { %v1290_v33 = vmax.f32 %v3142_v24, %v1280_v17  ;;  %v1331_v46 = vmax.f32 %v3142_v24, %v1323_v1  ;;  %v1326_v63 = vmax.f32 %v3142_v24, %v1318_v31  ;;  %v1296_v41 = vmin.f32 %v3146_v25, %v1287_v56 }
 0x51a   : > { %v3206_v22 = vsub.f32 %v1278_v3, %v1297_v29  ;;  %v1335_v2 = vmin.f32 %v3146_v25, %v1327_v37  ;;  %v1283_v16 = vmax.f32 %v3142_v24, %v3148_v14  ;;  %v3219_v15 = vsub.f32 %v1320_v43, %v1336_v59 }
 0x51b   : > { %v1299_v50 = vmin.f32 %v3146_v25, %v1290_v33  ;;  %v1339_v32 = vmin.f32 %v3146_v25, %v1331_v46  ;;  %v3217_v7 = vsub.f32 %v1277_v8, %v1296_v41  ;;  %v1334_v3 = vmin.f32 %v3146_v25, %v1326_v63 }
 0x51c   : > { %v1293_v48 = vmin.f32 %v3146_v25, %v1284_v54  ;;  %v1333_v13 = vmin.f32 %v3146_v25, %v1325_v44  ;;  %v1292_v33 = vmin.f32 %v3146_v25, %v1283_v16  ;;  %v3635_v54 = vld [vmem:[#allocation21_spill] sm:$0xff]  ;;  %v3636_v16 = vld [vmem:[#allocation18_spill] sm:$0xff] }
 0x51d   : > { %v3184_v4 = vsub.f32 %v1280_v17, %v1299_v50  ;;  %v3186_v51 = vsub.f32 %v1323_v1, %v1339_v32  ;;  %v1324_v17 = vmax.f32 %v3142_v24, %v1316_v55  ;;  %v1294_v1 = vmin.f32 %v3146_v25, %v1285_v45 }
 0x51e   : > { %v3227_v24 = vsub.f32 %v1319_v27, %v1335_v2  ;;  %v3235_v43 = vsub.f32 %v1318_v31, %v1334_v3  ;;  %v3240_v39 = vsub.f32 %v1274_v10, %v1293_v48  ;;  %v3242_v27 = vsub.f32 %v1317_v47, %v1333_v13  ;;  %v3637_v3 = vld [vmem:[#allocation16_spill] sm:$0xff]  ;;  %v3638_v13 = vld [vmem:[#allocation17_spill] sm:$0xff] }
 0x51f   : > { %1358 = vmatpush.msrb.mxu0 %v3184_v4  ;;  %1407 = vmatpush.msrb.mxu1 %v3186_v51  ;;  %v3233_v8 = vsub.f32 %v1275_v11, %v1294_v1  ;;  %v1332_v46 = vmin.f32 %v3146_v25, %v1324_v17  ;;  %v1300_v56 = vsub.f32 %v3148_v14, %v1292_v33  ;;  %v3633_v25 = vld [vmem:[#allocation22_spill] sm:$0xff]  ;;  %v1448_v45 = vstv %s1931_s13 }
 0x521   : > { %1359 = vmatpush.msrb.mxu0 %v3196_v23  ;;  %1408 = vmatpush.msrb.mxu1 %v3198_v9  ;;  %v3247_v11 = vsub.f32 %v1316_v55, %v1332_v46 }
 0x523   : > { %1360 = vmatpush.msrb.mxu0 %v3206_v22  ;;  %1409 = vmatpush.msrb.mxu1 %v3208_v57 }
 0x525   : > { %1361 = vmatpush.msrb.mxu0 %v3217_v7  ;;  %1410 = vmatpush.msrb.mxu1 %v3219_v15 }
 0x527   : > { %1362 = vmatpush.msrb.mxu0 %v3225_v60  ;;  %1411 = vmatpush.msrb.mxu1 %v3227_v24 }
 0x529   : > { %1363 = vmatpush.msrb.mxu0 %v3233_v8  ;;  %1412 = vmatpush.msrb.mxu1 %v3235_v43 }
 0x52b   : > { %1364 = vmatpush.msrb.mxu0 %v3240_v39  ;;  %1413 = vmatpush.msrb.mxu1 %v3242_v27 }
 0x52d   : > { %1365 = vmatpush.msrb.mxu0 %v1300_v56  ;;  %1414 = vmatpush.msrb.mxu1 %v3247_v11 }
 0x52e   : > { %1932 = vmatmul.msk.f32.vlgmr.msrb.gmra.mxu0 %vm405_vm1, %v3065_v34  ;;  %1940 = vmatmul.msk.f32.vlgmr.msrb.gmra.mxu1 %vm405_vm1, %v3065_v34 }
 0x536   : > { %1933 = vmatmul.msk.f32.gmra.mxu0 %vm405_vm1, %v3074_v42  ;;  %1941 = vmatmul.msk.f32.gmra.mxu1 %vm405_vm1, %v3074_v42 }
 0x53e   : > { %1934 = vmatmul.msk.f32.gmra.mxu0 %vm405_vm1, %v3083_v40  ;;  %1942 = vmatmul.msk.f32.gmra.mxu1 %vm405_vm1, %v3083_v40 }
 0x546   : > { %1935 = vmatmul.msk.f32.gmra.mxu0 %vm405_vm1, %v3092_v38  ;;  %1943 = vmatmul.msk.f32.gmra.mxu1 %vm405_vm1, %v3092_v38 }
 0x54e   : > { %1936 = vmatmul.msk.f32.gmra.mxu0 %vm405_vm1, %v3101_v6  ;;  %1944 = vmatmul.msk.f32.gmra.mxu1 %vm405_vm1, %v3101_v6 }
 0x556   : > { %1937 = vmatmul.msk.f32.gmra.mxu0 %vm405_vm1, %v3110_v28  ;;  %1945 = vmatmul.msk.f32.gmra.mxu1 %vm405_vm1, %v3110_v28 }
 0x55e   : > { %1938 = vmatmul.msk.f32.gmra.mxu0 %vm405_vm1, %v3119_v49  ;;  %1946 = vmatmul.msk.f32.gmra.mxu1 %vm405_vm1, %v3119_v49 }
 0x566   : > { %1939 = vmatmul.msk.f32.gmra.mxu0 %vm405_vm1, %v3633_v25  ;;  %1947 = vmatmul.msk.f32.gmra.mxu1 %vm405_vm1, %v3633_v25 }
 0x5ab   : > { %v1367_v14 = vpop.f32.mrf.mxu0  ;;  %v1416_v31 = vpop.f32.mrf.mxu1 }
 0x5ac   : > { %v1391_v55 = vsub.f32 %v1367_v14, %v3634_v53  ;;  %v1440_v2 = vsub.f32 %v1416_v31, %v3620_v12  ;;  %v3290_v53 = vstv %s1465_s12 }
 0x5ae   : > { %v1449_v62 = vmul.f32 %v1448_v45, %v1391_v55  ;;  %v1492_v31 = vmul.f32 %v1448_v45, %v1440_v2 }
 0x5b0   : > { %v3296_v55 = vsub.f32 %v1300_v56, %v1449_v62 }
 0x5b3   : > { %v1370_v5 = vpop.f32.mrf.mxu0  ;;  %v1419_v50 = vpop.f32.mrf.mxu1 }
 0x5b4   : > { %v1392_v62 = vsub.f32 %v1370_v5, %v2315_v18  ;;  %v1441_v2 = vsub.f32 %v1419_v50, %v2317_v19 }
 0x5bb   : > { %v1373_v32 = vpop.f32.mrf.mxu0  ;;  %v1422_v21 = vpop.f32.mrf.mxu1 }
 0x5c3   : > { %v1376_v26 = vpop.f32.mrf.mxu0  ;;  %v1425_v10 = vpop.f32.mrf.mxu1 }
 0x5cb   : > { %v1379_v47 = vpop.f32.mrf.mxu0  ;;  %v1428_v61 = vpop.f32.mrf.mxu1 }
 0x5cc   : > { %v1395_v48 = vsub.f32 %v1379_v47, %v3637_v3  ;;  %v1444_v33 = vsub.f32 %v1428_v61, %v3638_v13  ;;  %v3639_v47 = vld [vmem:[#allocation13_spill] sm:$0xff] }
 0x5ce   : > { %v1453_v61 = vmul.f32 %v1448_v45, %v1395_v48 }
 0x5d3   : > { %v1382_v37 = vpop.f32.mrf.mxu0  ;;  %v1431_v29 = vpop.f32.mrf.mxu1 }
 0x5d4   : > { %v1396_v17 = vsub.f32 %v1382_v37, %v3636_v16  ;;  %v1445_v1 = vsub.f32 %v1431_v29, %v3628_v52  ;;  %v1393_v29 = vsub.f32 %v1373_v32, %v2319_v20  ;;  %v1442_v52 = vsub.f32 %v1422_v21, %v3639_v47 }
 0x5d6   : > { %v1454_v37 = vmul.f32 %v1448_v45, %v1396_v17  ;;  %v1451_v3 = vmul.f32 %v1448_v45, %v1393_v29 }
 0x5d8   : > { %v1462_v21 = vsub.f32 %v3206_v22, %v1454_v37  ;;  %v1493_v22 = vmul.f32 %v1448_v45, %v1441_v2  ;;  %v1459_v37 = vsub.f32 %v3233_v8, %v1451_v3  ;;  %v1500_v2 = vsub.f32 %v3247_v11, %v1492_v31 }
 0x5db   : > { %v1385_v63 = vpop.f32.mrf.mxu0  ;;  %v1434_v41 = vpop.f32.mrf.mxu1 }
 0x5dc   : > { %v1397_v59 = vsub.f32 %v1385_v63, %v3625_v30  ;;  %v1446_v44 = vsub.f32 %v1434_v41, %v3635_v54  ;;  %v1394_v63 = vsub.f32 %v1376_v26, %v3615_v0  ;;  %v1443_v41 = vsub.f32 %v1425_v10, %v3623_v58 }
 0x5dd   : > { %v3294_v54 = vstv %s1349_s17  ;;  %v1497_v30 = vmul.f32 %v1448_v45, %v1445_v1  ;;  %s2095_s17 = scalar_lea.hbm %s3559_s4, 512 }
 0x5de   : > { %v1455_v46 = vmul.f32 %v1448_v45, %v1397_v59  ;;  %v1498_v14 = vmul.f32 %v1448_v45, %v1446_v44  ;;  %v1496_v59 = vmul.f32 %v1448_v45, %v1444_v33  ;;  %v1452_v17 = vmul.f32 %v1448_v45, %v1394_v63  ;;  %p2097_p2 = scmp.lt.s32.totalorder %s2095_s17, %s2091_s9 }
 0x5df   : > { %v1495_v32 = vmul.f32 %v1448_v45, %v1443_v41  ;;  %v1505_v1 = vsub.f32 %v3208_v57, %v1497_v30  ;;  %v1450_v63 = vmul.f32 %v1448_v45, %v1392_v62 }
 0x5e0   : > { %v1463_v13 = vsub.f32 %v3196_v23, %v1455_v46  ;;  %v1506_v26 = vsub.f32 %v3198_v9, %v1498_v14  ;;  %v1494_v23 = vmul.f32 %v1448_v45, %v1442_v52  ;;  %v1461_v9 = vsub.f32 %v3217_v7, %v1453_v61  ;;  %p2098_p3 = por %p2097_p2, %p2096_p1 }
 0x5e1   : > { %v1504_v46 = vsub.f32 %v3219_v15, %v1496_v59  ;;  %v1460_v30 = vsub.f32 %v3225_v60, %v1452_v17  ;;  %v1503_v57 = vsub.f32 %v3227_v24, %v1495_v32  ;;  %v1472_v52 = vmax.f32 %v3290_v53, %v1462_v21 }
 0x5e2   : > { %v1514_v5 = vmax.f32 %v3290_v53, %v1506_v26  ;;  %v1513_v7 = vmax.f32 %v3290_v53, %v1505_v1  ;;  %v1458_v59 = vsub.f32 %v3240_v39, %v1450_v63  ;;  %v1469_v17 = vmax.f32 %v3290_v53, %v1459_v37  ;;  %p2099_p4 = pnand %p2098_p3, %p2094_p13 }
 0x5e3   : > { %v1388_v44 = vpop.f32.mrf.mxu0  ;;  %v1437_v16 = vpop.f32.mrf.mxu1  ;;  %v1470_v8 = vmax.f32 %v3290_v53, %v1460_v30 }
 0x5e4   : > { %v1398_v10 = vsub.f32 %v1388_v44, %v2343_v35  ;;  %v1447_v56 = vsub.f32 %v1437_v16, %v2345_v36  ;;  %v1473_v16 = vmax.f32 %v3290_v53, %v1463_v13  ;;  %v1522_v61 = vmin.f32 %v3294_v54, %v1514_v5 }
 0x5e5   : > { %v1501_v44 = vsub.f32 %v3242_v27, %v1493_v22  ;;  %v1521_v62 = vmin.f32 %v3294_v54, %v1513_v7  ;;  %v1479_v31 = vmin.f32 %v3294_v54, %v1470_v8 }
 0x5e6   : > { %v1456_v48 = vmul.f32 %v1448_v45, %v1398_v10  ;;  %v1499_v33 = vmul.f32 %v1448_v45, %v1447_v56  ;;  %v1512_v45 = vmax.f32 %v3290_v53, %v1504_v46  ;;  %v1482_v29 = vmin.f32 %v3294_v54, %v1473_v16 }
 0x5e7   : > { %v1481_v56 = vmin.f32 %v3294_v54, %v1472_v52  ;;  %v1509_v11 = vmax.f32 %v3290_v53, %v1501_v44  ;;  %v3356_v5 = vsub.f32 %v1505_v1, %v1521_v62  ;;  %v3373_v52 = vsub.f32 %v1460_v30, %v1479_v31 }
 0x5e8   : > { %v1464_v50 = vsub.f32 %v3184_v4, %v1456_v48  ;;  %v1507_v14 = vsub.f32 %v3186_v51, %v1499_v33  ;;  %v1502_v4 = vsub.f32 %v3235_v43, %v1494_v23  ;;  %v1471_v51 = vmax.f32 %v3290_v53, %v1461_v9 }
 0x5e9   : > { %v1511_v43 = vmax.f32 %v3290_v53, %v1503_v57  ;;  %v3344_v32 = vsub.f32 %v1463_v13, %v1482_v29  ;;  %v3346_v48 = vsub.f32 %v1506_v26, %v1522_v61  ;;  %v1520_v33 = vmin.f32 %v3294_v54, %v1512_v45 }
 0x5ea   : > { %v1474_v15 = vmax.f32 %v3290_v53, %v1464_v50  ;;  %v1515_v41 = vmax.f32 %v3290_v53, %v1507_v14  ;;  %v1510_v39 = vmax.f32 %v3290_v53, %v1502_v4  ;;  %v1480_v27 = vmin.f32 %v3294_v54, %v1471_v51 }
 0x5eb   : > { %v1468_v23 = vmax.f32 %v3290_v53, %v1458_v59  ;;  %v3354_v16 = vsub.f32 %v1462_v21, %v1481_v56  ;;  %v1519_v13 = vmin.f32 %v3294_v54, %v1511_v43  ;;  %v1467_v26 = vmax.f32 %v3290_v53, %v3296_v55 }
 0x5ec   : > { %v1483_v60 = vmin.f32 %v3294_v54, %v1474_v15  ;;  %v1523_v24 = vmin.f32 %v3294_v54, %v1515_v41  ;;  %v3365_v63 = vsub.f32 %v1461_v9, %v1480_v27  ;;  %v3367_v22 = vsub.f32 %v1504_v46, %v1520_v33 }
 0x5ed   : > { %v1518_v21 = vmin.f32 %v3294_v54, %v1510_v39  ;;  %v1477_v1 = vmin.f32 %v3294_v54, %v1468_v23  ;;  %v1517_v7 = vmin.f32 %v3294_v54, %v1509_v11  ;;  %v1476_v15 = vmin.f32 %v3294_v54, %v1467_v26 }
 0x5ee   : > { %v3332_v3 = vsub.f32 %v1464_v50, %v1483_v60  ;;  %v3334_v10 = vsub.f32 %v1507_v14, %v1523_v24  ;;  %v1508_v50 = vmax.f32 %v3290_v53, %v1500_v2  ;;  %v1478_v14 = vmin.f32 %v3294_v54, %v1469_v17 }
 0x5ef   : > { %v3375_v53 = vsub.f32 %v1503_v57, %v1519_v13  ;;  %v3383_v46 = vsub.f32 %v1502_v4, %v1518_v21  ;;  %v1485_v30 = vsub.f32 %v1458_v59, %v1477_v1  ;;  %v1525_v57 = vsub.f32 %v1501_v44, %v1517_v7 }
 0x5f0   : > { %1542 = vmatpush.msrb.mxu2 %v3332_v3  ;;  %1591 = vmatpush.msrb.mxu3 %v3334_v10  ;;  %v3381_v9 = vsub.f32 %v1459_v37, %v1478_v14  ;;  %v1516_v41 = vmin.f32 %v3294_v54, %v1508_v50  ;;  %v1484_v51 = vsub.f32 %v3296_v55, %v1476_v15  ;;  %v3427_v55 = vstv %s1649_s15 }
 0x5f2   : > { %1543 = vmatpush.msrb.mxu2 %v3344_v32  ;;  %1592 = vmatpush.msrb.mxu3 %v3346_v48  ;;  %v1524_v45 = vsub.f32 %v1500_v2, %v1516_v41 }
 0x5f4   : > { %1544 = vmatpush.msrb.mxu2 %v3354_v16  ;;  %1593 = vmatpush.msrb.mxu3 %v3356_v5 }
 0x5f6   : > { %1545 = vmatpush.msrb.mxu2 %v3365_v63  ;;  %1594 = vmatpush.msrb.mxu3 %v3367_v22 }
 0x5f8   : > { %1546 = vmatpush.msrb.mxu2 %v3373_v52  ;;  %1595 = vmatpush.msrb.mxu3 %v3375_v53 }
 0x5fa   : > { %1547 = vmatpush.msrb.mxu2 %v3381_v9  ;;  %1596 = vmatpush.msrb.mxu3 %v3383_v46 }
 0x5fc   : > { %1548 = vmatpush.msrb.mxu2 %v1485_v30  ;;  %1597 = vmatpush.msrb.mxu3 %v1525_v57 }
 0x5fe   : > { %1549 = vmatpush.msrb.mxu2 %v1484_v51  ;;  %1598 = vmatpush.msrb.mxu3 %v1524_v45 }
 0x5ff   : > { %1949 = vmatmul.msk.f32.vlgmr.msrb.gmra.mxu2 %vm405_vm1, %v3065_v34  ;;  %1957 = vmatmul.msk.f32.vlgmr.msrb.gmra.mxu3 %vm405_vm1, %v3065_v34 }
 0x607   : > { %1950 = vmatmul.msk.f32.gmra.mxu2 %vm405_vm1, %v3074_v42  ;;  %1958 = vmatmul.msk.f32.gmra.mxu3 %vm405_vm1, %v3074_v42  ;;  %v3421_v42 = vstv %s1948_s14 }
 0x60f   : > { %1951 = vmatmul.msk.f32.gmra.mxu2 %vm405_vm1, %v3083_v40  ;;  %1959 = vmatmul.msk.f32.gmra.mxu3 %vm405_vm1, %v3083_v40 }
 0x617   : > { %1952 = vmatmul.msk.f32.gmra.mxu2 %vm405_vm1, %v3092_v38  ;;  %1960 = vmatmul.msk.f32.gmra.mxu3 %vm405_vm1, %v3092_v38  ;;  %v3640_v38 = vld [vmem:[#allocation11_spill] sm:$0xff] }
 0x61f   : > { %1953 = vmatmul.msk.f32.gmra.mxu2 %vm405_vm1, %v3101_v6  ;;  %1961 = vmatmul.msk.f32.gmra.mxu3 %vm405_vm1, %v3101_v6 }
 0x627   : > { %1954 = vmatmul.msk.f32.gmra.mxu2 %vm405_vm1, %v3110_v28  ;;  %1962 = vmatmul.msk.f32.gmra.mxu3 %vm405_vm1, %v3110_v28 }
 0x62f   : > { %1955 = vmatmul.msk.f32.gmra.mxu2 %vm405_vm1, %v3119_v49  ;;  %1963 = vmatmul.msk.f32.gmra.mxu3 %vm405_vm1, %v3119_v49 }
 0x637   : > { %1956 = vmatmul.msk.f32.gmra.mxu2 %vm405_vm1, %v3633_v25  ;;  %1964 = vmatmul.msk.f32.gmra.mxu3 %vm405_vm1, %v3633_v25  ;;  %v3429_v25 = vstv %s1533_s29 }
 0x682   : > { %v1551_v34 = vpop.f32.mrf.mxu2  ;;  %v1600_v40 = vpop.f32.mrf.mxu3 }
 0x683   : > { %v1575_v6 = vsub.f32 %v1551_v34, %v3640_v38  ;;  %v1624_v28 = vsub.f32 %v1600_v40, %v3620_v12 }
 0x685   : > { %v1633_v49 = vmul.f32 %v3421_v42, %v1575_v6  ;;  %v1676_v54 = vmul.f32 %v3421_v42, %v1624_v28 }
 0x687   : > { %v1641_v37 = vsub.f32 %v1484_v51, %v1633_v49  ;;  %v1684_v4 = vsub.f32 %v1524_v45, %v1676_v54 }
 0x689   : > { %v1651_v60 = vmax.f32 %v3427_v55, %v1641_v37  ;;  %v1692_v24 = vmax.f32 %v3427_v55, %v1684_v4 }
 0x68a   : > { %v1554_v29 = vpop.f32.mrf.mxu2  ;;  %v1603_v61 = vpop.f32.mrf.mxu3 }
 0x68b   : > { %v1660_v59 = vmin.f32 %v3429_v25, %v1651_v60  ;;  %v1700_v12 = vmin.f32 %v3429_v25, %v1692_v24  ;;  %v1576_v44 = vsub.f32 %v1554_v29, %v2315_v18  ;;  %v1625_v8 = vsub.f32 %v1603_v61, %v2317_v19  ;;  %v3642_v24 = vld [vmem:[#allocation17_spill] sm:$0xff] }
 0x68d   : > { %v1668_v43 = vsub.f32 %v1641_v37, %v1660_v59  ;;  %v1708_v56 = vsub.f32 %v1684_v4, %v1700_v12  ;;  %v1634_v62 = vmul.f32 %v3421_v42, %v1576_v44  ;;  %v1677_v2 = vmul.f32 %v3421_v42, %v1625_v8  ;;  %v3641_v4 = vld [vmem:[#allocation16_spill] sm:$0xff] }
 0x68f   : > { %1716 = vst [vmem:[%s3440_s18] sm:$0xff] %v1668_v43  ;;  %v1642_v17 = vsub.f32 %v1485_v30, %v1634_v62  ;;  %v1685_v39 = vsub.f32 %v1525_v57, %v1677_v2 }
 0x690   : > { %1724 = vst [vmem:[%s3440_s18 + $0x8] sm:$0xff] %v1708_v56 }
 0x691   : > { %v1652_v18 = vmax.f32 %v3427_v55, %v1642_v17  ;;  %v1693_v19 = vmax.f32 %v3427_v55, %v1685_v39 }
 0x692   : > { %v1557_v27 = vpop.f32.mrf.mxu2  ;;  %v1606_v33 = vpop.f32.mrf.mxu3 }
 0x693   : > { %v1661_v23 = vmin.f32 %v3429_v25, %v1652_v18  ;;  %v1701_v11 = vmin.f32 %v3429_v25, %v1693_v19  ;;  %v1577_v31 = vsub.f32 %v1557_v27, %v2319_v20  ;;  %v1626_v13 = vsub.f32 %v1606_v33, %v3639_v47  ;;  %v3644_v19 = vld [vmem:[#allocation19_spill] sm:$0xff] }
 0x695   : > { %v1669_v26 = vsub.f32 %v1642_v17, %v1661_v23  ;;  %v1709_v50 = vsub.f32 %v1685_v39, %v1701_v11  ;;  %v1635_v14 = vmul.f32 %v3421_v42, %v1577_v31  ;;  %v1678_v21 = vmul.f32 %v3421_v42, %v1626_v13  ;;  %v3643_v39 = vld [vmem:[#allocation18_spill] sm:$0xff] }
 0x697   : > { %1717 = vst [vmem:[%s3440_s18 + $0x10] sm:$0xff] %v1669_v26  ;;  %v1643_v1 = vsub.f32 %v3381_v9, %v1635_v14  ;;  %v1686_v7 = vsub.f32 %v3383_v46, %v1678_v21 }
 0x698   : > { %1725 = vst [vmem:[%s3440_s18 + $0x18] sm:$0xff] %v1709_v50 }
 0x699   : > { %v1653_v15 = vmax.f32 %v3427_v55, %v1643_v1  ;;  %v1694_v20 = vmax.f32 %v3427_v55, %v1686_v7 }
 0x69a   : > { %v1560_v41 = vpop.f32.mrf.mxu2  ;;  %v1609_v47 = vpop.f32.mrf.mxu3 }
 0x69b   : > { %v1662_v30 = vmin.f32 %v3429_v25, %v1653_v15  ;;  %v1702_v57 = vmin.f32 %v3429_v25, %v1694_v20  ;;  %v1578_v51 = vsub.f32 %v1560_v41, %v3615_v0  ;;  %v1627_v45 = vsub.f32 %v1609_v47, %v3623_v58  ;;  %v3646_v20 = vld [vmem:[#allocation21_spill] sm:$0xff] }
 0x69d   : > { %v1670_v34 = vsub.f32 %v1643_v1, %v1662_v30  ;;  %v1710_v9 = vsub.f32 %v1686_v7, %v1702_v57  ;;  %v1636_v46 = vmul.f32 %v3421_v42, %v1578_v51  ;;  %v1679_v40 = vmul.f32 %v3421_v42, %v1627_v45  ;;  %v3645_v7 = vld [vmem:[#allocation20_spill] sm:$0xff] }
 0x69f   : > { %1718 = vst [vmem:[%s3440_s18 + $0x20] sm:$0xff] %v1670_v34  ;;  %v1644_v38 = vsub.f32 %v3373_v52, %v1636_v46  ;;  %v1687_v6 = vsub.f32 %v3375_v53, %v1679_v40 }
 0x6a0   : > { %1726 = vst [vmem:[%s3440_s18 + $0x28] sm:$0xff] %v1710_v9 }
 0x6a1   : > { %v1654_v28 = vmax.f32 %v3427_v55, %v1644_v38  ;;  %v1695_v0 = vmax.f32 %v3427_v55, %v1687_v6 }
 0x6a2   : > { %v1563_v49 = vpop.f32.mrf.mxu2  ;;  %v1612_v58 = vpop.f32.mrf.mxu3 }
 0x6a3   : > { %v1663_v54 = vmin.f32 %v3429_v25, %v1654_v28  ;;  %v1703_v37 = vmin.f32 %v3429_v25, %v1695_v0  ;;  %v1579_v60 = vsub.f32 %v1563_v49, %v3641_v4  ;;  %v1628_v29 = vsub.f32 %v1612_v58, %v3642_v24 }
 0x6a5   : > { %v1671_v61 = vsub.f32 %v1644_v38, %v1663_v54  ;;  %v1711_v52 = vsub.f32 %v1687_v6, %v1703_v37  ;;  %v1637_v53 = vmul.f32 %v3421_v42, %v1579_v60  ;;  %v1680_v59 = vmul.f32 %v3421_v42, %v1628_v29 }
 0x6a7   : > { %1719 = vst [vmem:[%s3440_s18 + $0x30] sm:$0xff] %v1671_v61  ;;  %v1645_v12 = vsub.f32 %v3365_v63, %v1637_v53  ;;  %v1688_v44 = vsub.f32 %v3367_v22, %v1680_v59 }
 0x6a8   : > { %1727 = vst [vmem:[%s3440_s18 + $0x38] sm:$0xff] %v1711_v52 }
 0x6a9   : > { %v1655_v8 = vmax.f32 %v3427_v55, %v1645_v12  ;;  %v1696_v43 = vmax.f32 %v3427_v55, %v1688_v44 }
 0x6aa   : > { %v1566_v56 = vpop.f32.mrf.mxu2  ;;  %v1615_v62 = vpop.f32.mrf.mxu3 }
 0x6ab   : > { %v1664_v2 = vmin.f32 %v3429_v25, %v1655_v8  ;;  %v1704_v17 = vmin.f32 %v3429_v25, %v1696_v43  ;;  %v1580_v18 = vsub.f32 %v1566_v56, %v3643_v39  ;;  %v1629_v27 = vsub.f32 %v1615_v62, %v3644_v19 }
 0x6ad   : > { %v1672_v33 = vsub.f32 %v1645_v12, %v1664_v2  ;;  %v1712_v63 = vsub.f32 %v1688_v44, %v1704_v17  ;;  %v1638_v22 = vmul.f32 %v3421_v42, %v1580_v18  ;;  %v1681_v23 = vmul.f32 %v3421_v42, %v1629_v27 }
 0x6af   : > { %1720 = vst [vmem:[%s3440_s18 + $0x40] sm:$0xff] %v1672_v33  ;;  %v1646_v11 = vsub.f32 %v3354_v16, %v1638_v22  ;;  %v1689_v31 = vsub.f32 %v3356_v5, %v1681_v23 }
 0x6b0   : > { %1728 = vst [vmem:[%s3440_s18 + $0x48] sm:$0xff] %v1712_v63 }
 0x6b1   : > { %v1656_v13 = vmax.f32 %v3427_v55, %v1646_v11  ;;  %v1697_v26 = vmax.f32 %v3427_v55, %v1689_v31 }
 0x6b2   : > { %v1569_v50 = vpop.f32.mrf.mxu2  ;;  %v1618_v14 = vpop.f32.mrf.mxu3 }
 0x6b3   : > { %v1665_v21 = vmin.f32 %v3429_v25, %v1656_v13  ;;  %v1705_v1 = vmin.f32 %v3429_v25, %v1697_v26  ;;  %v1581_v15 = vsub.f32 %v1569_v50, %v3645_v7  ;;  %v1630_v41 = vsub.f32 %v1618_v14, %v3646_v20 }
 0x6b5   : > { %v1673_v47 = vsub.f32 %v1646_v11, %v1665_v21  ;;  %v1713_v16 = vsub.f32 %v1689_v31, %v1705_v1  ;;  %v1639_v5 = vmul.f32 %v3421_v42, %v1581_v15  ;;  %v1682_v30 = vmul.f32 %v3421_v42, %v1630_v41 }
 0x6b7   : > { %1721 = vst [vmem:[%s3440_s18 + $0x50] sm:$0xff] %v1673_v47  ;;  %v1647_v57 = vsub.f32 %v3344_v32, %v1639_v5  ;;  %v1690_v51 = vsub.f32 %v3346_v48, %v1682_v30 }
 0x6b8   : > { %1729 = vst [vmem:[%s3440_s18 + $0x58] sm:$0xff] %v1713_v16 }
 0x6b9   : > { %v1657_v45 = vmax.f32 %v3427_v55, %v1647_v57  ;;  %v1698_v34 = vmax.f32 %v3427_v55, %v1690_v51 }
 0x6ba   : > { %v1572_v9 = vpop.f32.mrf.mxu2  ;;  %v1621_v46 = vpop.f32.mrf.mxu3 }
 0x6bb   : > { %v1666_v40 = vmin.f32 %v3429_v25, %v1657_v45  ;;  %v1706_v38 = vmin.f32 %v3429_v25, %v1698_v34  ;;  %v1582_v6 = vsub.f32 %v1572_v9, %v2343_v35  ;;  %v1631_v32 = vsub.f32 %v1621_v46, %v2345_v36 }
 0x6bd   : > { %v1674_v28 = vsub.f32 %v1647_v57, %v1666_v40  ;;  %v1714_v48 = vsub.f32 %v1690_v51, %v1706_v38  ;;  %v1640_v0 = vmul.f32 %v3421_v42, %v1582_v6  ;;  %v1683_v49 = vmul.f32 %v3421_v42, %v1631_v32 }
 0x6bf   : > { %1722 = vst [vmem:[%s3440_s18 + $0x60] sm:$0xff] %v1674_v28  ;;  %v1648_v58 = vsub.f32 %v3332_v3, %v1640_v0  ;;  %v1691_v54 = vsub.f32 %v3334_v10, %v1683_v49 }
 0x6c0   : > { %1730 = vst [vmem:[%s3440_s18 + $0x68] sm:$0xff] %v1714_v48 }
 0x6c1   : > { %v1658_v35 = vmax.f32 %v3427_v55, %v1648_v58  ;;  %v1699_v36 = vmax.f32 %v3427_v55, %v1691_v54 }
 0x6c3   : > { %v1667_v42 = vmin.f32 %v3429_v25, %v1658_v35  ;;  %v1707_v37 = vmin.f32 %v3429_v25, %v1699_v36 }
 0x6c5   : > { %v1675_v3 = vsub.f32 %v1648_v58, %v1667_v42  ;;  %v1715_v4 = vsub.f32 %v1691_v54, %v1707_v37 }
 0x6c7   : > { %1723 = vst [vmem:[%s3440_s18 + $0x70] sm:$0xff] %v1675_v3 }
 0x6c8   : > { %1731 = vst [vmem:[%s3440_s18 + $0x78] sm:$0xff] %v1715_v4 }
 0x6c9   : > { %2102 = shalt.err (!%p2099_p4)
}
 0x6ca   : > { %s2149_s10 = smov 256   ;;  %s2150_s29 = smov 1024  }
 0x6cb   : > { %s2151_s15 = smov 16  }
 0x6cc   : > { %1974 = dma.vmem_to_hbm [thread:$0]  (%p2229_p10), %s1746_s0, 2048, %s1748_s7, %s1733_s6, %s2149_s10, %s2150_s29, %s2151_s15  }
 0x6cd PF: > { %p1985_p5 = scmp.ge.s32.totalorder %s2143_s22, 2  ;;  %s1762_s16 = sand.u32 1, %s2131_s19  }
 0x6ce   : > { %s1763_s18 = scalar_lea.sflag [#allocation6], %s1762_s16 }
 0x6cf   : > { %p1981_p7 = pnand %p1985_p5, %p2233_p11 }
 0x6d1   : > { %p1982_p8 = pneg %p1981_p7 }
 0x6d3   : > { %2126 = dma.done.wait (%p1982_p8), %s1763_s18, 2048  }
 0x6d4   : > { %2128 = vsyncadd (%p1982_p8), %s1763_s18, 4294965248  ;;  %p25_p9 = scmp.ge.s32.totalorder %s2205_s24, 6   ;;  %s3647_s19 = smov %s2135_s20 }
 0x6d5   : > { %s3648_s20 = smov %s2139_s21  ;;  %s3649_s21 = smov %s2217_s27 }
 0x6d6   : > { %s3650_s22 = smov %s2205_s24  ;;  %27 = sbr.rel (!%p25_p9) target bundleno = 11 (0xb), region = 77 }
 0x6db   :  { %1769 = vsyncpa [#allocation5], 1 }
 0x6dc   :  { %1771 = vsyncpa [#allocation5 + $0x1], 1 }
 0x6dd   :  { %1772 = vsyncpa [#allocation6], 1 }
 0x6de   :  { %1774 = vsyncpa [#allocation6 + $0x1], 1 }

</bundles_post_ra>
